<compile_context>
chip_gen: v5e
topology: v5e:2x2
jax: 0.10.0
libtpu: 0.0.40
codegen_flags: <defaults>
</compile_context>

<pallas_src>
import jax
import jax.numpy as jnp
from jax import lax
from jax.experimental import pallas as pl
from jax.experimental.pallas import tpu as pltpu

_LANE = 128
_VMEM = pl.BlockSpec(memory_space=pltpu.MemorySpace.VMEM)


# ----------------------------- fused Pallas kernel ---------------------------

def _make_fused_lstm_kernel(T, B, H, num_layers, matmul_dtype):
    """Fused kernel: num_layers x LSTM (wavefront schedule) + final Linear.

    Kernel ref layout:
      (x_ref[T*B, Din] (time-major, flattened),
       [wih[Din_l, 4H], whh[H, 4H], b[1, 4H]] * num_layers,
       fc_w[H, O_pad], fc_b[1, O_pad], out_ref[B, O_pad])
    Gate column order inside the kernel (set up by the wrapper): i, f, o, g.
    """

    def kernel(*refs):
        x_ref = refs[0]
        layer_refs = refs[1:1 + 3 * num_layers]
        fc_w_ref, fc_b_ref, out_ref = refs[1 + 3 * num_layers:]

        def mm(a, b):
            # Operands in matmul_dtype (bf16 fast path / f32 parity path);
            # accumulation always f32.
            return jnp.dot(a.astype(matmul_dtype), b.astype(matmul_dtype),
                           preferred_element_type=jnp.float32)

        # Load weights once (already stored in matmul_dtype by the wrapper).
        wih = [layer_refs[3 * l][...] for l in range(num_layers)]
        whh = [layer_refs[3 * l + 1][...] for l in range(num_layers)]
        # Bias broadcasts hoisted out of the recurrence (JAX does not CSE
        # broadcast_in_dim inside loops). Layer 0's bias is folded into the
        # batched input projection below.
        bias = [jnp.broadcast_to(layer_refs[3 * l + 2][...], (B, 4 * H))
                if l > 0 else None
                for l in range(num_layers)]

        # ---- Layer-0 input projection, batched over all timesteps ----------
        # One [T*B, Din] @ [Din, 4H] MXU call + one bias add, fully off the
        # serial h->h path. pre0[t*B:(t+1)*B] is the [B, 4H] slab for step t.
        pre0 = mm(x_ref[...], wih[0]) + jnp.broadcast_to(
            layer_refs[2][...], (T * B, 4 * H))

        def cell(pre_l, h_prev, c_prev, whh_l):
            # Gate order: i, f, o, g  (contiguous sigmoid block, tanh tail).
            gates = pre_l + mm(h_prev, whh_l)                  # [B, 4H] f32
            s = jax.nn.sigmoid(gates[:, :3 * H])               # i | f | o
            g_g = jnp.tanh(gates[:, 3 * H:])
            c_new = s[:, H:2 * H] * c_prev + s[:, :H] * g_g
            h_new = s[:, 2 * H:3 * H] * jnp.tanh(c_new)
            return h_new, c_new

        h = [jnp.zeros((B, H), jnp.float32) for _ in range(num_layers)]
        c = [jnp.zeros((B, H), jnp.float32) for _ in range(num_layers)]

        # ---- Wavefront (diagonal) schedule ----------------------------------
        # Diagonal d holds every cell (l, t) with l + t == d; they only depend
        # on diagonal d-1, so the dependent-step count is T + L - 1.
        for d in range(T + num_layers - 1):
            h_in = list(h)  # snapshot of per-layer h entering this diagonal
            for l in range(num_layers):
                t = d - l
                if 0 <= t < T:
                    if l == 0:
                        pre = pre0[t * B:(t + 1) * B, :]
                    else:
                        # Input projection from the layer below's time-t output
                        # (produced on diagonal d-1).
                        pre = mm(h_in[l - 1], wih[l]) + bias[l]
                    h[l], c[l] = cell(pre, h_in[l], c[l], whh[l])

        # nn.LSTM inter-layer dropout + final nn.Dropout: identity in eval.
        # Final Linear on the top layer's last hidden state; lane-dense store.
        out_ref[...] = mm(h[num_layers - 1], fc_w_ref[...]) + fc_b_ref[...]

    return kernel


# ----------------------------- wrapper ---------------------------------------

def _reorder_gate_cols(w, H):
    """Permute PyTorch gate order (i, f, g, o) -> kernel order (i, f, o, g)."""
    i, f, g, o = (w[..., k * H:(k + 1) * H] for k in range(4))
    return jnp.concatenate([i, f, o, g], axis=-1)


def lstm_price_predictor_forward(params, x, *, matmul_dtype=jnp.bfloat16):
    """x: [B, T, input_size] -> [B, output_size]."""
    B, T, Din = x.shape
    H = params["lstm"][0]["w_hh_t"].shape[0]
    num_layers = len(params["lstm"])
    O = params["fc_w_t"].shape[1]
    O_pad = ((O + _LANE - 1) // _LANE) * _LANE  # lane-dense output slab

    # Time-major then flattened to [T*B, Din] so the kernel's layer-0 input
    # projection is ONE matmul. Pre-cast operands so the bf16 path also halves
    # the HBM->VMEM DMA bytes.
    x_flat = (jnp.transpose(x, (1, 0, 2))
                 .reshape(T * B, Din)
                 .astype(matmul_dtype))

    # Pad FC weights/bias so the kernel's only HBM write is a full-lane store.
    fc_w_pad = jnp.zeros((H, O_pad), jnp.float32).at[:, :O].set(params["fc_w_t"])
    fc_b_pad = jnp.zeros((1, O_pad), jnp.float32).at[:, :O].set(params["fc_b"])

    inputs = [x_flat]
    for layer in params["lstm"]:
        inputs += [
            _reorder_gate_cols(layer["w_ih_t"], H).astype(matmul_dtype),
            _reorder_gate_cols(layer["w_hh_t"], H).astype(matmul_dtype),
            _reorder_gate_cols(layer["b"], H).astype(jnp.float32),
        ]
    inputs += [fc_w_pad.astype(matmul_dtype), fc_b_pad]

    kernel = _make_fused_lstm_kernel(T, B, H, num_layers, matmul_dtype)
    out_pad = pl.pallas_call(
        kernel,
        out_shape=jax.ShapeDtypeStruct((B, O_pad), jnp.float32),
        in_specs=[_VMEM] * len(inputs),
        out_specs=_VMEM,
    )(*inputs)
    return out_pad[:, :O]


# ----------------------------- params ----------------------------------------

def init_params(key, input_size, hidden_size, num_layers, output_size):
    """Deterministic init mirroring PyTorch shapes (U(-1/sqrt(H), 1/sqrt(H)))."""
    params = {"lstm": []}
    bound = 1.0 / jnp.sqrt(jnp.float32(hidden_size))
    keys = jax.random.split(key, num_layers * 4 + 2)
    kidx = 0
    for layer in range(num_layers):
        din = input_size if layer == 0 else hidden_size
        w_ih = jax.random.uniform(keys[kidx], (4 * hidden_size, din),
                                  jnp.float32, -bound, bound); kidx += 1
        w_hh = jax.random.uniform(keys[kidx], (4 * hidden_size, hidden_size),
                                  jnp.float32, -bound, bound); kidx += 1
        b_ih = jax.random.uniform(keys[kidx], (4 * hidden_size,),
                                  jnp.float32, -bound, bound); kidx += 1
        b_hh = jax.random.uniform(keys[kidx], (4 * hidden_size,),
                                  jnp.float32, -bound, bound); kidx += 1
        params["lstm"].append({
            "w_ih_t": w_ih.T,                                # [Din, 4H]  (i,f,g,o)
            "w_hh_t": w_hh.T,                                # [H, 4H]
            "b": (b_ih + b_hh).reshape(1, 4 * hidden_size),  # [1, 4H]
        })
    fc_w = jax.random.uniform(keys[kidx], (output_size, hidden_size),
                              jnp.float32, -bound, bound); kidx += 1
    fc_b = jax.random.uniform(keys[kidx], (output_size,),
                              jnp.float32, -bound, bound)
    params["fc_w_t"] = fc_w.T                    # [H, O]
    params["fc_b"] = fc_b.reshape(1, output_size)
    return params


# ----------------------------- pure-JAX reference -----------------------------

def _reference_forward(params, x):
    x_tm = jnp.transpose(x, (1, 0, 2)).astype(jnp.float32)
    B = x.shape[0]
    for layer in params["lstm"]:
        H = layer["w_hh_t"].shape[0]

        def step(carry, x_t):
            h, c = carry
            gates = x_t @ layer["w_ih_t"] + h @ layer["w_hh_t"] + layer["b"]
            i = jax.nn.sigmoid(gates[:, 0:H])
            f = jax.nn.sigmoid(gates[:, H:2 * H])
            g = jnp.tanh(gates[:, 2 * H:3 * H])
            o = jax.nn.sigmoid(gates[:, 3 * H:4 * H])
            c = f * c + i * g
            h = o * jnp.tanh(c)
            return (h, c), h

        init = (jnp.zeros((B, H), jnp.float32), jnp.zeros((B, H), jnp.float32))
        _, x_tm = lax.scan(step, init, x_tm)
    return x_tm[-1] @ params["fc_w_t"] + params["fc_b"]


# ----------------------------- main -------------------------------------------

if __name__ == "__main__":
    batch, seq, input_size = 4, 8, 8
    hidden_size, num_layers, output_size = 32, 2, 1

    key = jax.random.PRNGKey(0)
    k_param, k_x = jax.random.split(key)
    params = init_params(k_param, input_size, hidden_size, num_layers, output_size)
    x = jax.random.normal(k_x, (batch, seq, input_size), jnp.float32)

    ref = jax.block_until_ready(_reference_forward(params, x))

    # Exact-parity path: f32 MXU operands.
    out_f32 = jax.block_until_ready(
        lstm_price_predictor_forward(params, x, matmul_dtype=jnp.float32))
    assert out_f32.shape == (batch, output_size), out_f32.shape
    assert jnp.allclose(out_f32, ref, atol=1e-5, rtol=1e-5), (out_f32, ref)

    # Default fast path: bf16 MXU operands, f32 accumulation & activations.
    out = jax.block_until_ready(lstm_price_predictor_forward(params, x))
    assert out.shape == (batch, output_size), out.shape
    assert jnp.allclose(out, ref, atol=5e-2, rtol=5e-2), (out, ref)

    print("KERNEL_OK")
</pallas_src>

<mosaic_0001>
module attributes {stable_mosaic.version = 11 : i64} {
  func.func @kernel(%arg0: memref<32x8xf32, #tpu.memory_space<vmem>>, %arg1: memref<8x128xf32, #tpu.memory_space<vmem>>, %arg2: memref<32x128xf32, #tpu.memory_space<vmem>>, %arg3: memref<1x128xf32, #tpu.memory_space<vmem>>, %arg4: memref<32x128xf32, #tpu.memory_space<vmem>>, %arg5: memref<32x128xf32, #tpu.memory_space<vmem>>, %arg6: memref<1x128xf32, #tpu.memory_space<vmem>>, %arg7: memref<32x128xf32, #tpu.memory_space<vmem>>, %arg8: memref<1x128xf32, #tpu.memory_space<vmem>>, %arg9: memref<4x128xf32, #tpu.memory_space<vmem>>) attributes {dimension_semantics = [], scalar_prefetch = 0 : i64, scratch_operands = 0 : i64, tpu.core_type = #tpu.core_type<tc>} {
    %c0 = arith.constant 0 : index
    %c0_0 = arith.constant 0 : index
    %0 = vector.load %arg1[%c0, %c0_0] : memref<8x128xf32, #tpu.memory_space<vmem>>, vector<8x128xf32>
    %c0_1 = arith.constant 0 : index
    %c0_2 = arith.constant 0 : index
    %1 = vector.load %arg4[%c0_1, %c0_2] : memref<32x128xf32, #tpu.memory_space<vmem>>, vector<32x128xf32>
    %c0_3 = arith.constant 0 : index
    %c0_4 = arith.constant 0 : index
    %2 = vector.load %arg2[%c0_3, %c0_4] : memref<32x128xf32, #tpu.memory_space<vmem>>, vector<32x128xf32>
    %c0_5 = arith.constant 0 : index
    %c0_6 = arith.constant 0 : index
    %3 = vector.load %arg5[%c0_5, %c0_6] : memref<32x128xf32, #tpu.memory_space<vmem>>, vector<32x128xf32>
    %c0_7 = arith.constant 0 : index
    %c0_8 = arith.constant 0 : index
    %4 = vector.load %arg6[%c0_7, %c0_8] : memref<1x128xf32, #tpu.memory_space<vmem>>, vector<1x128xf32>
    %5 = vector.shape_cast %4 : vector<1x128xf32> to vector<1x128xf32>
    %6 = vector.broadcast %5 : vector<1x128xf32> to vector<4x128xf32>
    %c0_9 = arith.constant 0 : index
    %c0_10 = arith.constant 0 : index
    %7 = vector.load %arg0[%c0_9, %c0_10] : memref<32x8xf32, #tpu.memory_space<vmem>>, vector<32x8xf32>
    %cst = arith.constant dense<0.000000e+00> : vector<32x128xf32>
    %8 = tpu.matmul %7, %0, %cst {dimension_numbers = #tpu.dot_dimension_numbers<[1], [0], [0], [1], [0, 0, 1, 1], [], []>} : vector<32x8xf32>, vector<8x128xf32>, vector<32x128xf32> -> vector<32x128xf32>
    %c0_11 = arith.constant 0 : index
    %c0_12 = arith.constant 0 : index
    %9 = vector.load %arg3[%c0_11, %c0_12] : memref<1x128xf32, #tpu.memory_space<vmem>>, vector<1x128xf32>
    %10 = vector.shape_cast %9 : vector<1x128xf32> to vector<1x128xf32>
    %11 = vector.broadcast %10 : vector<1x128xf32> to vector<32x128xf32>
    %12 = arith.addf %8, %11 : vector<32x128xf32>
    %cst_13 = arith.constant 0.000000e+00 : f32
    %13 = vector.broadcast %cst_13 : f32 to vector<4x32xf32>
    %cst_14 = arith.constant 0.000000e+00 : f32
    %14 = vector.broadcast %cst_14 : f32 to vector<4x32xf32>
    %cst_15 = arith.constant 0.000000e+00 : f32
    %15 = vector.broadcast %cst_15 : f32 to vector<4x32xf32>
    %cst_16 = arith.constant 0.000000e+00 : f32
    %16 = vector.broadcast %cst_16 : f32 to vector<4x32xf32>
    %17 = vector.extract_strided_slice %12 {offsets = [0, 0], sizes = [4, 128], strides = [1, 1]} : vector<32x128xf32> to vector<4x128xf32>
    %cst_17 = arith.constant dense<0.000000e+00> : vector<4x128xf32>
    %18 = tpu.matmul %13, %2, %cst_17 {dimension_numbers = #tpu.dot_dimension_numbers<[1], [0], [0], [1], [0, 0, 1, 1], [], []>} : vector<4x32xf32>, vector<32x128xf32>, vector<4x128xf32> -> vector<4x128xf32>
    %19 = arith.addf %17, %18 : vector<4x128xf32>
    %20 = vector.extract_strided_slice %19 {offsets = [0, 0], sizes = [4, 96], strides = [1, 1]} : vector<4x128xf32> to vector<4x96xf32>
    %21 = arith.negf %20 : vector<4x96xf32>
    %22 = math.exp %21 : vector<4x96xf32>
    %cst_18 = arith.constant 1.000000e+00 : f32
    %23 = vector.broadcast %cst_18 : f32 to vector<4x96xf32>
    %24 = arith.addf %23, %22 : vector<4x96xf32>
    %25 = arith.divf %23, %24 : vector<4x96xf32>
    %26 = vector.extract_strided_slice %19 {offsets = [0, 96], sizes = [4, 32], strides = [1, 1]} : vector<4x128xf32> to vector<4x32xf32>
    %27 = math.tanh %26 : vector<4x32xf32>
    %28 = vector.extract_strided_slice %25 {offsets = [0, 32], sizes = [4, 32], strides = [1, 1]} : vector<4x96xf32> to vector<4x32xf32>
    %29 = arith.mulf %28, %15 : vector<4x32xf32>
    %30 = vector.extract_strided_slice %25 {offsets = [0, 0], sizes = [4, 32], strides = [1, 1]} : vector<4x96xf32> to vector<4x32xf32>
    %31 = arith.mulf %30, %27 : vector<4x32xf32>
    %32 = arith.addf %29, %31 : vector<4x32xf32>
    %33 = vector.extract_strided_slice %25 {offsets = [0, 64], sizes = [4, 32], strides = [1, 1]} : vector<4x96xf32> to vector<4x32xf32>
    %34 = math.tanh %32 : vector<4x32xf32>
    %35 = arith.mulf %33, %34 : vector<4x32xf32>
    %36 = vector.extract_strided_slice %12 {offsets = [4, 0], sizes = [4, 128], strides = [1, 1]} : vector<32x128xf32> to vector<4x128xf32>
    %cst_19 = arith.constant dense<0.000000e+00> : vector<4x128xf32>
    %37 = tpu.matmul %35, %2, %cst_19 {dimension_numbers = #tpu.dot_dimension_numbers<[1], [0], [0], [1], [0, 0, 1, 1], [], []>} : vector<4x32xf32>, vector<32x128xf32>, vector<4x128xf32> -> vector<4x128xf32>
    %38 = arith.addf %36, %37 : vector<4x128xf32>
    %39 = vector.extract_strided_slice %38 {offsets = [0, 0], sizes = [4, 96], strides = [1, 1]} : vector<4x128xf32> to vector<4x96xf32>
    %40 = arith.negf %39 : vector<4x96xf32>
    %41 = math.exp %40 : vector<4x96xf32>
    %cst_20 = arith.constant 1.000000e+00 : f32
    %42 = vector.broadcast %cst_20 : f32 to vector<4x96xf32>
    %43 = arith.addf %42, %41 : vector<4x96xf32>
    %44 = arith.divf %42, %43 : vector<4x96xf32>
    %45 = vector.extract_strided_slice %38 {offsets = [0, 96], sizes = [4, 32], strides = [1, 1]} : vector<4x128xf32> to vector<4x32xf32>
    %46 = math.tanh %45 : vector<4x32xf32>
    %47 = vector.extract_strided_slice %44 {offsets = [0, 32], sizes = [4, 32], strides = [1, 1]} : vector<4x96xf32> to vector<4x32xf32>
    %48 = arith.mulf %47, %32 : vector<4x32xf32>
    %49 = vector.extract_strided_slice %44 {offsets = [0, 0], sizes = [4, 32], strides = [1, 1]} : vector<4x96xf32> to vector<4x32xf32>
    %50 = arith.mulf %49, %46 : vector<4x32xf32>
    %51 = arith.addf %48, %50 : vector<4x32xf32>
    %52 = vector.extract_strided_slice %44 {offsets = [0, 64], sizes = [4, 32], strides = [1, 1]} : vector<4x96xf32> to vector<4x32xf32>
    %53 = math.tanh %51 : vector<4x32xf32>
    %54 = arith.mulf %52, %53 : vector<4x32xf32>
    %cst_21 = arith.constant dense<0.000000e+00> : vector<4x128xf32>
    %55 = tpu.matmul %35, %1, %cst_21 {dimension_numbers = #tpu.dot_dimension_numbers<[1], [0], [0], [1], [0, 0, 1, 1], [], []>} : vector<4x32xf32>, vector<32x128xf32>, vector<4x128xf32> -> vector<4x128xf32>
    %56 = arith.addf %55, %6 : vector<4x128xf32>
    %cst_22 = arith.constant dense<0.000000e+00> : vector<4x128xf32>
    %57 = tpu.matmul %14, %3, %cst_22 {dimension_numbers = #tpu.dot_dimension_numbers<[1], [0], [0], [1], [0, 0, 1, 1], [], []>} : vector<4x32xf32>, vector<32x128xf32>, vector<4x128xf32> -> vector<4x128xf32>
    %58 = arith.addf %56, %57 : vector<4x128xf32>
    %59 = vector.extract_strided_slice %58 {offsets = [0, 0], sizes = [4, 96], strides = [1, 1]} : vector<4x128xf32> to vector<4x96xf32>
    %60 = arith.negf %59 : vector<4x96xf32>
    %61 = math.exp %60 : vector<4x96xf32>
    %cst_23 = arith.constant 1.000000e+00 : f32
    %62 = vector.broadcast %cst_23 : f32 to vector<4x96xf32>
    %63 = arith.addf %62, %61 : vector<4x96xf32>
    %64 = arith.divf %62, %63 : vector<4x96xf32>
    %65 = vector.extract_strided_slice %58 {offsets = [0, 96], sizes = [4, 32], strides = [1, 1]} : vector<4x128xf32> to vector<4x32xf32>
    %66 = math.tanh %65 : vector<4x32xf32>
    %67 = vector.extract_strided_slice %64 {offsets = [0, 32], sizes = [4, 32], strides = [1, 1]} : vector<4x96xf32> to vector<4x32xf32>
    %68 = arith.mulf %67, %16 : vector<4x32xf32>
    %69 = vector.extract_strided_slice %64 {offsets = [0, 0], sizes = [4, 32], strides = [1, 1]} : vector<4x96xf32> to vector<4x32xf32>
    %70 = arith.mulf %69, %66 : vector<4x32xf32>
    %71 = arith.addf %68, %70 : vector<4x32xf32>
    %72 = vector.extract_strided_slice %64 {offsets = [0, 64], sizes = [4, 32], strides = [1, 1]} : vector<4x96xf32> to vector<4x32xf32>
    %73 = math.tanh %71 : vector<4x32xf32>
    %74 = arith.mulf %72, %73 : vector<4x32xf32>
    %75 = vector.extract_strided_slice %12 {offsets = [8, 0], sizes = [4, 128], strides = [1, 1]} : vector<32x128xf32> to vector<4x128xf32>
    %cst_24 = arith.constant dense<0.000000e+00> : vector<4x128xf32>
    %76 = tpu.matmul %54, %2, %cst_24 {dimension_numbers = #tpu.dot_dimension_numbers<[1], [0], [0], [1], [0, 0, 1, 1], [], []>} : vector<4x32xf32>, vector<32x128xf32>, vector<4x128xf32> -> vector<4x128xf32>
    %77 = arith.addf %75, %76 : vector<4x128xf32>
    %78 = vector.extract_strided_slice %77 {offsets = [0, 0], sizes = [4, 96], strides = [1, 1]} : vector<4x128xf32> to vector<4x96xf32>
    %79 = arith.negf %78 : vector<4x96xf32>
    %80 = math.exp %79 : vector<4x96xf32>
    %cst_25 = arith.constant 1.000000e+00 : f32
    %81 = vector.broadcast %cst_25 : f32 to vector<4x96xf32>
    %82 = arith.addf %81, %80 : vector<4x96xf32>
    %83 = arith.divf %81, %82 : vector<4x96xf32>
    %84 = vector.extract_strided_slice %77 {offsets = [0, 96], sizes = [4, 32], strides = [1, 1]} : vector<4x128xf32> to vector<4x32xf32>
    %85 = math.tanh %84 : vector<4x32xf32>
    %86 = vector.extract_strided_slice %83 {offsets = [0, 32], sizes = [4, 32], strides = [1, 1]} : vector<4x96xf32> to vector<4x32xf32>
    %87 = arith.mulf %86, %51 : vector<4x32xf32>
    %88 = vector.extract_strided_slice %83 {offsets = [0, 0], sizes = [4, 32], strides = [1, 1]} : vector<4x96xf32> to vector<4x32xf32>
    %89 = arith.mulf %88, %85 : vector<4x32xf32>
    %90 = arith.addf %87, %89 : vector<4x32xf32>
    %91 = vector.extract_strided_slice %83 {offsets = [0, 64], sizes = [4, 32], strides = [1, 1]} : vector<4x96xf32> to vector<4x32xf32>
    %92 = math.tanh %90 : vector<4x32xf32>
    %93 = arith.mulf %91, %92 : vector<4x32xf32>
    %cst_26 = arith.constant dense<0.000000e+00> : vector<4x128xf32>
    %94 = tpu.matmul %54, %1, %cst_26 {dimension_numbers = #tpu.dot_dimension_numbers<[1], [0], [0], [1], [0, 0, 1, 1], [], []>} : vector<4x32xf32>, vector<32x128xf32>, vector<4x128xf32> -> vector<4x128xf32>
    %95 = arith.addf %94, %6 : vector<4x128xf32>
    %cst_27 = arith.constant dense<0.000000e+00> : vector<4x128xf32>
    %96 = tpu.matmul %74, %3, %cst_27 {dimension_numbers = #tpu.dot_dimension_numbers<[1], [0], [0], [1], [0, 0, 1, 1], [], []>} : vector<4x32xf32>, vector<32x128xf32>, vector<4x128xf32> -> vector<4x128xf32>
    %97 = arith.addf %95, %96 : vector<4x128xf32>
    %98 = vector.extract_strided_slice %97 {offsets = [0, 0], sizes = [4, 96], strides = [1, 1]} : vector<4x128xf32> to vector<4x96xf32>
    %99 = arith.negf %98 : vector<4x96xf32>
    %100 = math.exp %99 : vector<4x96xf32>
    %cst_28 = arith.constant 1.000000e+00 : f32
    %101 = vector.broadcast %cst_28 : f32 to vector<4x96xf32>
    %102 = arith.addf %101, %100 : vector<4x96xf32>
    %103 = arith.divf %101, %102 : vector<4x96xf32>
    %104 = vector.extract_strided_slice %97 {offsets = [0, 96], sizes = [4, 32], strides = [1, 1]} : vector<4x128xf32> to vector<4x32xf32>
    %105 = math.tanh %104 : vector<4x32xf32>
    %106 = vector.extract_strided_slice %103 {offsets = [0, 32], sizes = [4, 32], strides = [1, 1]} : vector<4x96xf32> to vector<4x32xf32>
    %107 = arith.mulf %106, %71 : vector<4x32xf32>
    %108 = vector.extract_strided_slice %103 {offsets = [0, 0], sizes = [4, 32], strides = [1, 1]} : vector<4x96xf32> to vector<4x32xf32>
    %109 = arith.mulf %108, %105 : vector<4x32xf32>
    %110 = arith.addf %107, %109 : vector<4x32xf32>
    %111 = vector.extract_strided_slice %103 {offsets = [0, 64], sizes = [4, 32], strides = [1, 1]} : vector<4x96xf32> to vector<4x32xf32>
    %112 = math.tanh %110 : vector<4x32xf32>
    %113 = arith.mulf %111, %112 : vector<4x32xf32>
    %114 = vector.extract_strided_slice %12 {offsets = [12, 0], sizes = [4, 128], strides = [1, 1]} : vector<32x128xf32> to vector<4x128xf32>
    %cst_29 = arith.constant dense<0.000000e+00> : vector<4x128xf32>
    %115 = tpu.matmul %93, %2, %cst_29 {dimension_numbers = #tpu.dot_dimension_numbers<[1], [0], [0], [1], [0, 0, 1, 1], [], []>} : vector<4x32xf32>, vector<32x128xf32>, vector<4x128xf32> -> vector<4x128xf32>
    %116 = arith.addf %114, %115 : vector<4x128xf32>
    %117 = vector.extract_strided_slice %116 {offsets = [0, 0], sizes = [4, 96], strides = [1, 1]} : vector<4x128xf32> to vector<4x96xf32>
    %118 = arith.negf %117 : vector<4x96xf32>
    %119 = math.exp %118 : vector<4x96xf32>
    %cst_30 = arith.constant 1.000000e+00 : f32
    %120 = vector.broadcast %cst_30 : f32 to vector<4x96xf32>
    %121 = arith.addf %120, %119 : vector<4x96xf32>
    %122 = arith.divf %120, %121 : vector<4x96xf32>
    %123 = vector.extract_strided_slice %116 {offsets = [0, 96], sizes = [4, 32], strides = [1, 1]} : vector<4x128xf32> to vector<4x32xf32>
    %124 = math.tanh %123 : vector<4x32xf32>
    %125 = vector.extract_strided_slice %122 {offsets = [0, 32], sizes = [4, 32], strides = [1, 1]} : vector<4x96xf32> to vector<4x32xf32>
    %126 = arith.mulf %125, %90 : vector<4x32xf32>
    %127 = vector.extract_strided_slice %122 {offsets = [0, 0], sizes = [4, 32], strides = [1, 1]} : vector<4x96xf32> to vector<4x32xf32>
    %128 = arith.mulf %127, %124 : vector<4x32xf32>
    %129 = arith.addf %126, %128 : vector<4x32xf32>
    %130 = vector.extract_strided_slice %122 {offsets = [0, 64], sizes = [4, 32], strides = [1, 1]} : vector<4x96xf32> to vector<4x32xf32>
    %131 = math.tanh %129 : vector<4x32xf32>
    %132 = arith.mulf %130, %131 : vector<4x32xf32>
    %cst_31 = arith.constant dense<0.000000e+00> : vector<4x128xf32>
    %133 = tpu.matmul %93, %1, %cst_31 {dimension_numbers = #tpu.dot_dimension_numbers<[1], [0], [0], [1], [0, 0, 1, 1], [], []>} : vector<4x32xf32>, vector<32x128xf32>, vector<4x128xf32> -> vector<4x128xf32>
    %134 = arith.addf %133, %6 : vector<4x128xf32>
    %cst_32 = arith.constant dense<0.000000e+00> : vector<4x128xf32>
    %135 = tpu.matmul %113, %3, %cst_32 {dimension_numbers = #tpu.dot_dimension_numbers<[1], [0], [0], [1], [0, 0, 1, 1], [], []>} : vector<4x32xf32>, vector<32x128xf32>, vector<4x128xf32> -> vector<4x128xf32>
    %136 = arith.addf %134, %135 : vector<4x128xf32>
    %137 = vector.extract_strided_slice %136 {offsets = [0, 0], sizes = [4, 96], strides = [1, 1]} : vector<4x128xf32> to vector<4x96xf32>
    %138 = arith.negf %137 : vector<4x96xf32>
    %139 = math.exp %138 : vector<4x96xf32>
    %cst_33 = arith.constant 1.000000e+00 : f32
    %140 = vector.broadcast %cst_33 : f32 to vector<4x96xf32>
    %141 = arith.addf %140, %139 : vector<4x96xf32>
    %142 = arith.divf %140, %141 : vector<4x96xf32>
    %143 = vector.extract_strided_slice %136 {offsets = [0, 96], sizes = [4, 32], strides = [1, 1]} : vector<4x128xf32> to vector<4x32xf32>
    %144 = math.tanh %143 : vector<4x32xf32>
    %145 = vector.extract_strided_slice %142 {offsets = [0, 32], sizes = [4, 32], strides = [1, 1]} : vector<4x96xf32> to vector<4x32xf32>
    %146 = arith.mulf %145, %110 : vector<4x32xf32>
    %147 = vector.extract_strided_slice %142 {offsets = [0, 0], sizes = [4, 32], strides = [1, 1]} : vector<4x96xf32> to vector<4x32xf32>
    %148 = arith.mulf %147, %144 : vector<4x32xf32>
    %149 = arith.addf %146, %148 : vector<4x32xf32>
    %150 = vector.extract_strided_slice %142 {offsets = [0, 64], sizes = [4, 32], strides = [1, 1]} : vector<4x96xf32> to vector<4x32xf32>
    %151 = math.tanh %149 : vector<4x32xf32>
    %152 = arith.mulf %150, %151 : vector<4x32xf32>
    %153 = vector.extract_strided_slice %12 {offsets = [16, 0], sizes = [4, 128], strides = [1, 1]} : vector<32x128xf32> to vector<4x128xf32>
    %cst_34 = arith.constant dense<0.000000e+00> : vector<4x128xf32>
    %154 = tpu.matmul %132, %2, %cst_34 {dimension_numbers = #tpu.dot_dimension_numbers<[1], [0], [0], [1], [0, 0, 1, 1], [], []>} : vector<4x32xf32>, vector<32x128xf32>, vector<4x128xf32> -> vector<4x128xf32>
    %155 = arith.addf %153, %154 : vector<4x128xf32>
    %156 = vector.extract_strided_slice %155 {offsets = [0, 0], sizes = [4, 96], strides = [1, 1]} : vector<4x128xf32> to vector<4x96xf32>
    %157 = arith.negf %156 : vector<4x96xf32>
    %158 = math.exp %157 : vector<4x96xf32>
    %cst_35 = arith.constant 1.000000e+00 : f32
    %159 = vector.broadcast %cst_35 : f32 to vector<4x96xf32>
    %160 = arith.addf %159, %158 : vector<4x96xf32>
    %161 = arith.divf %159, %160 : vector<4x96xf32>
    %162 = vector.extract_strided_slice %155 {offsets = [0, 96], sizes = [4, 32], strides = [1, 1]} : vector<4x128xf32> to vector<4x32xf32>
    %163 = math.tanh %162 : vector<4x32xf32>
    %164 = vector.extract_strided_slice %161 {offsets = [0, 32], sizes = [4, 32], strides = [1, 1]} : vector<4x96xf32> to vector<4x32xf32>
    %165 = arith.mulf %164, %129 : vector<4x32xf32>
    %166 = vector.extract_strided_slice %161 {offsets = [0, 0], sizes = [4, 32], strides = [1, 1]} : vector<4x96xf32> to vector<4x32xf32>
    %167 = arith.mulf %166, %163 : vector<4x32xf32>
    %168 = arith.addf %165, %167 : vector<4x32xf32>
    %169 = vector.extract_strided_slice %161 {offsets = [0, 64], sizes = [4, 32], strides = [1, 1]} : vector<4x96xf32> to vector<4x32xf32>
    %170 = math.tanh %168 : vector<4x32xf32>
    %171 = arith.mulf %169, %170 : vector<4x32xf32>
    %cst_36 = arith.constant dense<0.000000e+00> : vector<4x128xf32>
    %172 = tpu.matmul %132, %1, %cst_36 {dimension_numbers = #tpu.dot_dimension_numbers<[1], [0], [0], [1], [0, 0, 1, 1], [], []>} : vector<4x32xf32>, vector<32x128xf32>, vector<4x128xf32> -> vector<4x128xf32>
    %173 = arith.addf %172, %6 : vector<4x128xf32>
    %cst_37 = arith.constant dense<0.000000e+00> : vector<4x128xf32>
    %174 = tpu.matmul %152, %3, %cst_37 {dimension_numbers = #tpu.dot_dimension_numbers<[1], [0], [0], [1], [0, 0, 1, 1], [], []>} : vector<4x32xf32>, vector<32x128xf32>, vector<4x128xf32> -> vector<4x128xf32>
    %175 = arith.addf %173, %174 : vector<4x128xf32>
    %176 = vector.extract_strided_slice %175 {offsets = [0, 0], sizes = [4, 96], strides = [1, 1]} : vector<4x128xf32> to vector<4x96xf32>
    %177 = arith.negf %176 : vector<4x96xf32>
    %178 = math.exp %177 : vector<4x96xf32>
    %cst_38 = arith.constant 1.000000e+00 : f32
    %179 = vector.broadcast %cst_38 : f32 to vector<4x96xf32>
    %180 = arith.addf %179, %178 : vector<4x96xf32>
    %181 = arith.divf %179, %180 : vector<4x96xf32>
    %182 = vector.extract_strided_slice %175 {offsets = [0, 96], sizes = [4, 32], strides = [1, 1]} : vector<4x128xf32> to vector<4x32xf32>
    %183 = math.tanh %182 : vector<4x32xf32>
    %184 = vector.extract_strided_slice %181 {offsets = [0, 32], sizes = [4, 32], strides = [1, 1]} : vector<4x96xf32> to vector<4x32xf32>
    %185 = arith.mulf %184, %149 : vector<4x32xf32>
    %186 = vector.extract_strided_slice %181 {offsets = [0, 0], sizes = [4, 32], strides = [1, 1]} : vector<4x96xf32> to vector<4x32xf32>
    %187 = arith.mulf %186, %183 : vector<4x32xf32>
    %188 = arith.addf %185, %187 : vector<4x32xf32>
    %189 = vector.extract_strided_slice %181 {offsets = [0, 64], sizes = [4, 32], strides = [1, 1]} : vector<4x96xf32> to vector<4x32xf32>
    %190 = math.tanh %188 : vector<4x32xf32>
    %191 = arith.mulf %189, %190 : vector<4x32xf32>
    %192 = vector.extract_strided_slice %12 {offsets = [20, 0], sizes = [4, 128], strides = [1, 1]} : vector<32x128xf32> to vector<4x128xf32>
    %cst_39 = arith.constant dense<0.000000e+00> : vector<4x128xf32>
    %193 = tpu.matmul %171, %2, %cst_39 {dimension_numbers = #tpu.dot_dimension_numbers<[1], [0], [0], [1], [0, 0, 1, 1], [], []>} : vector<4x32xf32>, vector<32x128xf32>, vector<4x128xf32> -> vector<4x128xf32>
    %194 = arith.addf %192, %193 : vector<4x128xf32>
    %195 = vector.extract_strided_slice %194 {offsets = [0, 0], sizes = [4, 96], strides = [1, 1]} : vector<4x128xf32> to vector<4x96xf32>
    %196 = arith.negf %195 : vector<4x96xf32>
    %197 = math.exp %196 : vector<4x96xf32>
    %cst_40 = arith.constant 1.000000e+00 : f32
    %198 = vector.broadcast %cst_40 : f32 to vector<4x96xf32>
    %199 = arith.addf %198, %197 : vector<4x96xf32>
    %200 = arith.divf %198, %199 : vector<4x96xf32>
    %201 = vector.extract_strided_slice %194 {offsets = [0, 96], sizes = [4, 32], strides = [1, 1]} : vector<4x128xf32> to vector<4x32xf32>
    %202 = math.tanh %201 : vector<4x32xf32>
    %203 = vector.extract_strided_slice %200 {offsets = [0, 32], sizes = [4, 32], strides = [1, 1]} : vector<4x96xf32> to vector<4x32xf32>
    %204 = arith.mulf %203, %168 : vector<4x32xf32>
    %205 = vector.extract_strided_slice %200 {offsets = [0, 0], sizes = [4, 32], strides = [1, 1]} : vector<4x96xf32> to vector<4x32xf32>
    %206 = arith.mulf %205, %202 : vector<4x32xf32>
    %207 = arith.addf %204, %206 : vector<4x32xf32>
    %208 = vector.extract_strided_slice %200 {offsets = [0, 64], sizes = [4, 32], strides = [1, 1]} : vector<4x96xf32> to vector<4x32xf32>
    %209 = math.tanh %207 : vector<4x32xf32>
    %210 = arith.mulf %208, %209 : vector<4x32xf32>
    %cst_41 = arith.constant dense<0.000000e+00> : vector<4x128xf32>
    %211 = tpu.matmul %171, %1, %cst_41 {dimension_numbers = #tpu.dot_dimension_numbers<[1], [0], [0], [1], [0, 0, 1, 1], [], []>} : vector<4x32xf32>, vector<32x128xf32>, vector<4x128xf32> -> vector<4x128xf32>
    %212 = arith.addf %211, %6 : vector<4x128xf32>
    %cst_42 = arith.constant dense<0.000000e+00> : vector<4x128xf32>
    %213 = tpu.matmul %191, %3, %cst_42 {dimension_numbers = #tpu.dot_dimension_numbers<[1], [0], [0], [1], [0, 0, 1, 1], [], []>} : vector<4x32xf32>, vector<32x128xf32>, vector<4x128xf32> -> vector<4x128xf32>
    %214 = arith.addf %212, %213 : vector<4x128xf32>
    %215 = vector.extract_strided_slice %214 {offsets = [0, 0], sizes = [4, 96], strides = [1, 1]} : vector<4x128xf32> to vector<4x96xf32>
    %216 = arith.negf %215 : vector<4x96xf32>
    %217 = math.exp %216 : vector<4x96xf32>
    %cst_43 = arith.constant 1.000000e+00 : f32
    %218 = vector.broadcast %cst_43 : f32 to vector<4x96xf32>
    %219 = arith.addf %218, %217 : vector<4x96xf32>
    %220 = arith.divf %218, %219 : vector<4x96xf32>
    %221 = vector.extract_strided_slice %214 {offsets = [0, 96], sizes = [4, 32], strides = [1, 1]} : vector<4x128xf32> to vector<4x32xf32>
    %222 = math.tanh %221 : vector<4x32xf32>
    %223 = vector.extract_strided_slice %220 {offsets = [0, 32], sizes = [4, 32], strides = [1, 1]} : vector<4x96xf32> to vector<4x32xf32>
    %224 = arith.mulf %223, %188 : vector<4x32xf32>
    %225 = vector.extract_strided_slice %220 {offsets = [0, 0], sizes = [4, 32], strides = [1, 1]} : vector<4x96xf32> to vector<4x32xf32>
    %226 = arith.mulf %225, %222 : vector<4x32xf32>
    %227 = arith.addf %224, %226 : vector<4x32xf32>
    %228 = vector.extract_strided_slice %220 {offsets = [0, 64], sizes = [4, 32], strides = [1, 1]} : vector<4x96xf32> to vector<4x32xf32>
    %229 = math.tanh %227 : vector<4x32xf32>
    %230 = arith.mulf %228, %229 : vector<4x32xf32>
    %231 = vector.extract_strided_slice %12 {offsets = [24, 0], sizes = [4, 128], strides = [1, 1]} : vector<32x128xf32> to vector<4x128xf32>
    %cst_44 = arith.constant dense<0.000000e+00> : vector<4x128xf32>
    %232 = tpu.matmul %210, %2, %cst_44 {dimension_numbers = #tpu.dot_dimension_numbers<[1], [0], [0], [1], [0, 0, 1, 1], [], []>} : vector<4x32xf32>, vector<32x128xf32>, vector<4x128xf32> -> vector<4x128xf32>
    %233 = arith.addf %231, %232 : vector<4x128xf32>
    %234 = vector.extract_strided_slice %233 {offsets = [0, 0], sizes = [4, 96], strides = [1, 1]} : vector<4x128xf32> to vector<4x96xf32>
    %235 = arith.negf %234 : vector<4x96xf32>
    %236 = math.exp %235 : vector<4x96xf32>
    %cst_45 = arith.constant 1.000000e+00 : f32
    %237 = vector.broadcast %cst_45 : f32 to vector<4x96xf32>
    %238 = arith.addf %237, %236 : vector<4x96xf32>
    %239 = arith.divf %237, %238 : vector<4x96xf32>
    %240 = vector.extract_strided_slice %233 {offsets = [0, 96], sizes = [4, 32], strides = [1, 1]} : vector<4x128xf32> to vector<4x32xf32>
    %241 = math.tanh %240 : vector<4x32xf32>
    %242 = vector.extract_strided_slice %239 {offsets = [0, 32], sizes = [4, 32], strides = [1, 1]} : vector<4x96xf32> to vector<4x32xf32>
    %243 = arith.mulf %242, %207 : vector<4x32xf32>
    %244 = vector.extract_strided_slice %239 {offsets = [0, 0], sizes = [4, 32], strides = [1, 1]} : vector<4x96xf32> to vector<4x32xf32>
    %245 = arith.mulf %244, %241 : vector<4x32xf32>
    %246 = arith.addf %243, %245 : vector<4x32xf32>
    %247 = vector.extract_strided_slice %239 {offsets = [0, 64], sizes = [4, 32], strides = [1, 1]} : vector<4x96xf32> to vector<4x32xf32>
    %248 = math.tanh %246 : vector<4x32xf32>
    %249 = arith.mulf %247, %248 : vector<4x32xf32>
    %cst_46 = arith.constant dense<0.000000e+00> : vector<4x128xf32>
    %250 = tpu.matmul %210, %1, %cst_46 {dimension_numbers = #tpu.dot_dimension_numbers<[1], [0], [0], [1], [0, 0, 1, 1], [], []>} : vector<4x32xf32>, vector<32x128xf32>, vector<4x128xf32> -> vector<4x128xf32>
    %251 = arith.addf %250, %6 : vector<4x128xf32>
    %cst_47 = arith.constant dense<0.000000e+00> : vector<4x128xf32>
    %252 = tpu.matmul %230, %3, %cst_47 {dimension_numbers = #tpu.dot_dimension_numbers<[1], [0], [0], [1], [0, 0, 1, 1], [], []>} : vector<4x32xf32>, vector<32x128xf32>, vector<4x128xf32> -> vector<4x128xf32>
    %253 = arith.addf %251, %252 : vector<4x128xf32>
    %254 = vector.extract_strided_slice %253 {offsets = [0, 0], sizes = [4, 96], strides = [1, 1]} : vector<4x128xf32> to vector<4x96xf32>
    %255 = arith.negf %254 : vector<4x96xf32>
    %256 = math.exp %255 : vector<4x96xf32>
    %cst_48 = arith.constant 1.000000e+00 : f32
    %257 = vector.broadcast %cst_48 : f32 to vector<4x96xf32>
    %258 = arith.addf %257, %256 : vector<4x96xf32>
    %259 = arith.divf %257, %258 : vector<4x96xf32>
    %260 = vector.extract_strided_slice %253 {offsets = [0, 96], sizes = [4, 32], strides = [1, 1]} : vector<4x128xf32> to vector<4x32xf32>
    %261 = math.tanh %260 : vector<4x32xf32>
    %262 = vector.extract_strided_slice %259 {offsets = [0, 32], sizes = [4, 32], strides = [1, 1]} : vector<4x96xf32> to vector<4x32xf32>
    %263 = arith.mulf %262, %227 : vector<4x32xf32>
    %264 = vector.extract_strided_slice %259 {offsets = [0, 0], sizes = [4, 32], strides = [1, 1]} : vector<4x96xf32> to vector<4x32xf32>
    %265 = arith.mulf %264, %261 : vector<4x32xf32>
    %266 = arith.addf %263, %265 : vector<4x32xf32>
    %267 = vector.extract_strided_slice %259 {offsets = [0, 64], sizes = [4, 32], strides = [1, 1]} : vector<4x96xf32> to vector<4x32xf32>
    %268 = math.tanh %266 : vector<4x32xf32>
    %269 = arith.mulf %267, %268 : vector<4x32xf32>
    %270 = vector.extract_strided_slice %12 {offsets = [28, 0], sizes = [4, 128], strides = [1, 1]} : vector<32x128xf32> to vector<4x128xf32>
    %cst_49 = arith.constant dense<0.000000e+00> : vector<4x128xf32>
    %271 = tpu.matmul %249, %2, %cst_49 {dimension_numbers = #tpu.dot_dimension_numbers<[1], [0], [0], [1], [0, 0, 1, 1], [], []>} : vector<4x32xf32>, vector<32x128xf32>, vector<4x128xf32> -> vector<4x128xf32>
    %272 = arith.addf %270, %271 : vector<4x128xf32>
    %273 = vector.extract_strided_slice %272 {offsets = [0, 0], sizes = [4, 96], strides = [1, 1]} : vector<4x128xf32> to vector<4x96xf32>
    %274 = arith.negf %273 : vector<4x96xf32>
    %275 = math.exp %274 : vector<4x96xf32>
    %cst_50 = arith.constant 1.000000e+00 : f32
    %276 = vector.broadcast %cst_50 : f32 to vector<4x96xf32>
    %277 = arith.addf %276, %275 : vector<4x96xf32>
    %278 = arith.divf %276, %277 : vector<4x96xf32>
    %279 = vector.extract_strided_slice %272 {offsets = [0, 96], sizes = [4, 32], strides = [1, 1]} : vector<4x128xf32> to vector<4x32xf32>
    %280 = math.tanh %279 : vector<4x32xf32>
    %281 = vector.extract_strided_slice %278 {offsets = [0, 32], sizes = [4, 32], strides = [1, 1]} : vector<4x96xf32> to vector<4x32xf32>
    %282 = arith.mulf %281, %246 : vector<4x32xf32>
    %283 = vector.extract_strided_slice %278 {offsets = [0, 0], sizes = [4, 32], strides = [1, 1]} : vector<4x96xf32> to vector<4x32xf32>
    %284 = arith.mulf %283, %280 : vector<4x32xf32>
    %285 = arith.addf %282, %284 : vector<4x32xf32>
    %286 = vector.extract_strided_slice %278 {offsets = [0, 64], sizes = [4, 32], strides = [1, 1]} : vector<4x96xf32> to vector<4x32xf32>
    %287 = math.tanh %285 : vector<4x32xf32>
    %288 = arith.mulf %286, %287 : vector<4x32xf32>
    %cst_51 = arith.constant dense<0.000000e+00> : vector<4x128xf32>
    %289 = tpu.matmul %249, %1, %cst_51 {dimension_numbers = #tpu.dot_dimension_numbers<[1], [0], [0], [1], [0, 0, 1, 1], [], []>} : vector<4x32xf32>, vector<32x128xf32>, vector<4x128xf32> -> vector<4x128xf32>
    %290 = arith.addf %289, %6 : vector<4x128xf32>
    %cst_52 = arith.constant dense<0.000000e+00> : vector<4x128xf32>
    %291 = tpu.matmul %269, %3, %cst_52 {dimension_numbers = #tpu.dot_dimension_numbers<[1], [0], [0], [1], [0, 0, 1, 1], [], []>} : vector<4x32xf32>, vector<32x128xf32>, vector<4x128xf32> -> vector<4x128xf32>
    %292 = arith.addf %290, %291 : vector<4x128xf32>
    %293 = vector.extract_strided_slice %292 {offsets = [0, 0], sizes = [4, 96], strides = [1, 1]} : vector<4x128xf32> to vector<4x96xf32>
    %294 = arith.negf %293 : vector<4x96xf32>
    %295 = math.exp %294 : vector<4x96xf32>
    %cst_53 = arith.constant 1.000000e+00 : f32
    %296 = vector.broadcast %cst_53 : f32 to vector<4x96xf32>
    %297 = arith.addf %296, %295 : vector<4x96xf32>
    %298 = arith.divf %296, %297 : vector<4x96xf32>
    %299 = vector.extract_strided_slice %292 {offsets = [0, 96], sizes = [4, 32], strides = [1, 1]} : vector<4x128xf32> to vector<4x32xf32>
    %300 = math.tanh %299 : vector<4x32xf32>
    %301 = vector.extract_strided_slice %298 {offsets = [0, 32], sizes = [4, 32], strides = [1, 1]} : vector<4x96xf32> to vector<4x32xf32>
    %302 = arith.mulf %301, %266 : vector<4x32xf32>
    %303 = vector.extract_strided_slice %298 {offsets = [0, 0], sizes = [4, 32], strides = [1, 1]} : vector<4x96xf32> to vector<4x32xf32>
    %304 = arith.mulf %303, %300 : vector<4x32xf32>
    %305 = arith.addf %302, %304 : vector<4x32xf32>
    %306 = vector.extract_strided_slice %298 {offsets = [0, 64], sizes = [4, 32], strides = [1, 1]} : vector<4x96xf32> to vector<4x32xf32>
    %307 = math.tanh %305 : vector<4x32xf32>
    %308 = arith.mulf %306, %307 : vector<4x32xf32>
    %cst_54 = arith.constant dense<0.000000e+00> : vector<4x128xf32>
    %309 = tpu.matmul %288, %1, %cst_54 {dimension_numbers = #tpu.dot_dimension_numbers<[1], [0], [0], [1], [0, 0, 1, 1], [], []>} : vector<4x32xf32>, vector<32x128xf32>, vector<4x128xf32> -> vector<4x128xf32>
    %310 = arith.addf %309, %6 : vector<4x128xf32>
    %cst_55 = arith.constant dense<0.000000e+00> : vector<4x128xf32>
    %311 = tpu.matmul %308, %3, %cst_55 {dimension_numbers = #tpu.dot_dimension_numbers<[1], [0], [0], [1], [0, 0, 1, 1], [], []>} : vector<4x32xf32>, vector<32x128xf32>, vector<4x128xf32> -> vector<4x128xf32>
    %312 = arith.addf %310, %311 : vector<4x128xf32>
    %313 = vector.extract_strided_slice %312 {offsets = [0, 0], sizes = [4, 96], strides = [1, 1]} : vector<4x128xf32> to vector<4x96xf32>
    %314 = arith.negf %313 : vector<4x96xf32>
    %315 = math.exp %314 : vector<4x96xf32>
    %cst_56 = arith.constant 1.000000e+00 : f32
    %316 = vector.broadcast %cst_56 : f32 to vector<4x96xf32>
    %317 = arith.addf %316, %315 : vector<4x96xf32>
    %318 = arith.divf %316, %317 : vector<4x96xf32>
    %319 = vector.extract_strided_slice %312 {offsets = [0, 96], sizes = [4, 32], strides = [1, 1]} : vector<4x128xf32> to vector<4x32xf32>
    %320 = math.tanh %319 : vector<4x32xf32>
    %321 = vector.extract_strided_slice %318 {offsets = [0, 32], sizes = [4, 32], strides = [1, 1]} : vector<4x96xf32> to vector<4x32xf32>
    %322 = arith.mulf %321, %305 : vector<4x32xf32>
    %323 = vector.extract_strided_slice %318 {offsets = [0, 0], sizes = [4, 32], strides = [1, 1]} : vector<4x96xf32> to vector<4x32xf32>
    %324 = arith.mulf %323, %320 : vector<4x32xf32>
    %325 = arith.addf %322, %324 : vector<4x32xf32>
    %326 = vector.extract_strided_slice %318 {offsets = [0, 64], sizes = [4, 32], strides = [1, 1]} : vector<4x96xf32> to vector<4x32xf32>
    %327 = math.tanh %325 : vector<4x32xf32>
    %328 = arith.mulf %326, %327 : vector<4x32xf32>
    %c0_57 = arith.constant 0 : index
    %c0_58 = arith.constant 0 : index
    %329 = vector.load %arg7[%c0_57, %c0_58] : memref<32x128xf32, #tpu.memory_space<vmem>>, vector<32x128xf32>
    %cst_59 = arith.constant dense<0.000000e+00> : vector<4x128xf32>
    %330 = tpu.matmul %328, %329, %cst_59 {dimension_numbers = #tpu.dot_dimension_numbers<[1], [0], [0], [1], [0, 0, 1, 1], [], []>} : vector<4x32xf32>, vector<32x128xf32>, vector<4x128xf32> -> vector<4x128xf32>
    %c0_60 = arith.constant 0 : index
    %c0_61 = arith.constant 0 : index
    %331 = vector.load %arg8[%c0_60, %c0_61] : memref<1x128xf32, #tpu.memory_space<vmem>>, vector<1x128xf32>
    %332 = vector.broadcast %331 : vector<1x128xf32> to vector<4x128xf32>
    %333 = arith.addf %330, %332 : vector<4x128xf32>
    %c0_62 = arith.constant 0 : index
    %c0_63 = arith.constant 0 : index
    %334 = vector.load %arg9[%c0_62, %c0_63] : memref<4x128xf32, #tpu.memory_space<vmem>>, vector<4x128xf32>
    tpu.vector_store %arg9[%c0_62, %c0_63], %333 {strides = array<i32>} : memref<4x128xf32, #tpu.memory_space<vmem>>, vector<4x128xf32>,
    return
  }
}

</mosaic_0001>

<bundles_post_ra>
// kernel: tpu_custom_call.1
= control target key start
LH: loop header
LB: loop body
LE: loop exit
PB: predicated region body
PF: predicated region fallthrough
CT: control target
= control target key end

     0   :  { %14 = vsyncpa [#allocation3], 0  ;;  %s2104_s0 = inlined_call_operand.vmem [shape: f32[32,8], index: 0, kind: input, shape index: {}]   ;;  %s2105_s1 = inlined_call_operand.vmem [shape: f32[8,128], index: 1, kind: input, shape index: {}]   ;;  %s2106_s2 = inlined_call_operand.vmem [shape: f32[32,128], index: 2, kind: input, shape index: {}]   ;;  %s2107_s3 = inlined_call_operand.vmem [shape: f32[1,128], index: 3, kind: input, shape index: {}]   ;;  %s2108_s4 = inlined_call_operand.hbm [shape: f32[32,128], index: 4, kind: input, shape index: {}]   ;;  %s2109_s5 = inlined_call_operand.hbm [shape: f32[32,128], index: 5, kind: input, shape index: {}]   ;;  %s2110_s6 = inlined_call_operand.vmem [shape: f32[1,128], index: 6, kind: input, shape index: {}]   ;;  %s2111_s7 = inlined_call_operand.hbm [shape: f32[32,128], index: 7, kind: input, shape index: {}]   ;;  %s2112_s8 = inlined_call_operand.vmem [shape: f32[1,128], index: 8, kind: input, shape index: {}]   ;;  %s2113_s9 = inlined_call_operand.hbm [shape: f32[4,128], index: 9, kind: output, shape index: {}]  }
   0x1   :  { %15 = vsyncpa [#allocation6], 0 }
   0x2   :  { %16 = vsyncpa [#allocation4], 0  ;;  %s42_s11 = sshll.u32 %s2109_s5, 4  ;;  %s1690_s12 = smov [#allocation5]   ;;  %s43_s11 = int_to_ptr.hbm [resolvable:$true] %s42_s11 }
   0x3   :  { %s44_s13 = sshll.u32 %s1690_s12, 4  ;;  %s29_s16 = sshll.u32 %s2108_s4, 4  ;;  %s45_s13 = int_to_ptr.vmem [resolvable:$true] %s44_s13  ;;  %s30_s16 = int_to_ptr.hbm [resolvable:$true] %s29_s16 }
   0x4   :  { %s1691_s17 = smov 128   ;;  %s1692_s18 = smov 8  }
   0x5   :  { %50 = dma.hbm_to_vmem [thread:$0]  %s43_s11, 512, %s45_s13, [#allocation6], %s1691_s17, %s1691_s17, %s1692_s18  }
   0x6   :  { %s1693_s19 = smov [#allocation2]   ;;  %s57_s23 = sshll.u32 %s2111_s7, 4  ;;  %s58_s23 = int_to_ptr.hbm [resolvable:$true] %s57_s23 }
   0x7   :  { %s31_s20 = sshll.u32 %s1693_s19, 4  ;;  %s1694_s5 = smov [#allocation7]   ;;  %s32_s20 = int_to_ptr.vmem [resolvable:$true] %s31_s20 }
   0x8   :  { %37 = dma.hbm_to_vmem [thread:$0]  %s30_s16, 512, %s32_s20, [#allocation3], %s1691_s17, %s1691_s17, %s1692_s18  }
   0x9   :  { %s59_s24 = sshll.u32 %s1694_s5, 4  ;;  %s60_s24 = int_to_ptr.vmem [resolvable:$true] %s59_s24 }
   0xa   :  { %65 = dma.hbm_to_vmem [thread:$0]  %s58_s23, 512, %s60_s24, [#allocation6], %s1691_s17, %s1691_s17, %s1692_s18  }
   0xb   :  { %1684 = dma.done.wait [#allocation3], 512  }
   0xc   :  { %1685 = vsyncadd [#allocation3], 4294966784 }
   0xd   :  { %1686 = dma.done.wait [#allocation6], 1024  }
   0xe   :  { %1687 = vsyncadd [#allocation6], 4294966272  ;;  %vm105_vm0 = vcmask 64512   ;;  %v1761_v0 = vld [vmem:[%s2106_s2 + $0x18] sm:$0xff]  ;;  %v1766_v1 = vld [vmem:[%s2106_s2 + $0x10] sm:$0xff]  ;;  %v1695_v6 = vmov 0.0  }
   0xf   :  { %v80_v2 = vld [vmem:[%s2105_s1] sm:$0xff]  ;;  %163 = vmatpush.msra.mxu1 %v1761_v0  ;;  %v1778_v4 = vld [vmem:[%s2106_s2 + $0x8] sm:$0xff]  ;;  %226 = vmatpush.msra.mxu2 %v1761_v0  ;;  %s1696_s14 = smov 32   ;;  %v1813_v32 = vld [vmem:[#allocation2 + $0x18] sm:$0xff]  ;;  %s1697_s15 = smov 64   ;;  %vm147_vm5 = vcmask 261120  }
  0x10   :  { %133 = vmatpush.msra.mxu0 %v80_v2  ;;  %v97_v3 = vld [vmem:[%s2104_s0] sm:$0xff]  ;;  %v1815_v33 = vld [vmem:[#allocation2 + $0x10] sm:$0xff]  ;;  %290 = vmatpush.msra.mxu3 %v1813_v32  ;;  %v1818_v34 = vld [vmem:[#allocation2 + $0x8] sm:$0xff]  ;;  %s1698_s25 = smov [#allocation8]   ;;  %s1392_s28 = sshll.u32 %s2113_s9, 4  ;;  %s1393_s28 = int_to_ptr.hbm [resolvable:$true] %s1392_s28 }
  0x11   :  { %1403 = vmatmul.msk.f32.vlgmr.msra.gmra.mxu0 %vm105_vm0, %v97_v3  ;;  %164 = vmatpush.msra.mxu1 %v1766_v1  ;;  %v1786_v5 = vld [vmem:[%s2106_s2] sm:$0xff]  ;;  %v1830_v38 = vld [vmem:[#allocation5 + $0x18] sm:$0xff]  ;;  %v1832_v39 = vld [vmem:[#allocation5 + $0x10] sm:$0xff]  ;;  %s1390_s26 = sshll.u32 %s1698_s25, 4  ;;  %s1391_s26 = int_to_ptr.vmem [resolvable:$true] %s1390_s26 }
  0x12   :  { %227 = vmatpush.msra.mxu2 %v1766_v1  ;;  %v1801_v7 = vld [vmem:[%s2107_s3] ss:$0 sm:$0xff]  ;;  %291 = vmatpush.msra.mxu3 %v1815_v33  ;;  %v1836_v40 = vld [vmem:[#allocation5 + $0x8] sm:$0xff] }
  0x13   :  { %165 = vmatpush.msra.mxu1 %v1778_v4  ;;  %v1821_v35 = vld [vmem:[#allocation2] sm:$0xff]  ;;  %762 = vmatpush.msrb.mxu0 %v1830_v38 }
  0x14   :  { %228 = vmatpush.msra.mxu2 %v1778_v4  ;;  %292 = vmatpush.msra.mxu3 %v1818_v34  ;;  %v1840_v41 = vld [vmem:[#allocation5] sm:$0xff] }
  0x15   :  { %166 = vmatpush.msra.mxu1 %v1786_v5  ;;  %763 = vmatpush.msrb.mxu0 %v1832_v39  ;;  %v1872_v45 = vld [vmem:[%s2110_s6] ss:$0 sm:$0xff] }
  0x16   :  { %167 = vmatmul.f32.vlgmr.msra.gmra.mxu1 %v1695_v6  ;;  %229 = vmatpush.msra.mxu2 %v1786_v5 }
  0x17   :  { %293 = vmatpush.msra.mxu3 %v1821_v35  ;;  %310 = vmatpush.msrb.mxu1 %v1830_v38 }
  0x18   :  { %374 = vmatpush.msrb.mxu2 %v1761_v0  ;;  %764 = vmatpush.msrb.mxu0 %v1836_v40 }
  0x19   :  { %435 = vmatpush.msrb.mxu3 %v1813_v32  ;;  %311 = vmatpush.msrb.mxu1 %v1832_v39 }
  0x1a   :  { %375 = vmatpush.msrb.mxu2 %v1766_v1  ;;  %765 = vmatpush.msrb.mxu0 %v1840_v41 }
  0x1b   :  { %436 = vmatpush.msrb.mxu3 %v1815_v33  ;;  %312 = vmatpush.msrb.mxu1 %v1836_v40 }
  0x1c   :  { %376 = vmatpush.msrb.mxu2 %v1778_v4  ;;  %978 = vmatpush.msra.mxu0 %v1761_v0 }
  0x1d   :  { %437 = vmatpush.msrb.mxu3 %v1818_v34  ;;  %313 = vmatpush.msrb.mxu1 %v1840_v41 }
  0x1e   :  { %377 = vmatpush.msrb.mxu2 %v1786_v5  ;;  %314 = vmatmul.f32.vlgmr.msrb.gmra.mxu1 %v1695_v6 }
  0x1f   :  { %438 = vmatpush.msrb.mxu3 %v1821_v35  ;;  %460 = vmatpush.msra.mxu1 %v1830_v38 }
  0x20   :  { %979 = vmatpush.msra.mxu0 %v1766_v1 }
  0x21   :  { %461 = vmatpush.msra.mxu1 %v1832_v39 }
  0x22   :  { %980 = vmatpush.msra.mxu0 %v1778_v4 }
  0x23   :  { %462 = vmatpush.msra.mxu1 %v1836_v40 }
  0x24   :  { %981 = vmatpush.msra.mxu0 %v1786_v5 }
  0x25   :  { %463 = vmatpush.msra.mxu1 %v1840_v41 }
  0x27   :  { %612 = vmatpush.msrb.mxu1 %v1830_v38 }
  0x29   :  { %613 = vmatpush.msrb.mxu1 %v1832_v39 }
  0x2b   :  { %614 = vmatpush.msrb.mxu1 %v1836_v40 }
  0x2d   :  { %615 = vmatpush.msrb.mxu1 %v1840_v41 }
  0x8e   :  { %v135_v8 = vpop.f32.mrf.mxu0 }
  0x8f   :  { %v1804_v9 = vadd.f32 %v1801_v7, %v135_v8 }
  0x93   :  { %v168_v10 = vpop.f32.mrf.mxu1 }
  0x94   :  { %v171_v11 = vadd.f32 %v168_v10, %v1804_v9 }
  0x96   :  { %1458 = vtanh.f32 %v171_v11  ;;  %v1407_v13 = vmul.f32 -1.442695, %v171_v11 }
  0x98   :  { %1460 = vpow2.f32 %v1407_v13 }
  0x9b   :  { %v315_v49 = vpop.f32.mrf.mxu1 }
  0x9c   :  { %v1459_v12 = vpop.eup %1458 }
  0x9d   :  { %194 = vrot.lane.b32.xlu0 %v1459_v12, %s1696_s14 }
  0x9e   :  { %v1461_v14 = vpop.eup %1460 }
  0x9f   :  { %v175_v15 = vadd.f32 1.0, %v1461_v14 }
  0xa1   :  { %1462 = vrcp.f32 %v175_v15  ;;  %v187_v21 = vand.u32 2147483648, %v175_v15  ;;  %vm181_vm2 = vweird.f32 %v175_v15  ;;  %v185_v22 = vand.u32 2147483647, %v175_v15 }
  0xa3   :  { %v188_v24 = vor.u32 1.1754944e-38, %v187_v21  ;;  %vm186_vm4 = vcmp.eq.f32.partialorder %v185_v22, 8.507059e+37 }
  0xa7   :  { %v1463_v16 = vpop.eup %1462 }
  0xa8   :  { %v177_v17 = vmul.f32 %v1463_v16, %v175_v15  ;;  %vm182_vm1 = vweird.f32 %v1463_v16 }
  0xa9   :  { %vm183_vm3 = vmor %vm181_vm2, %vm182_vm1 }
  0xaa   :  { %v178_v18 = vsub.f32 1.0, %v177_v17 }
  0xac   :  { %v179_v19 = vmul.f32 %v1463_v16, %v178_v18 }
  0xae   :  { %v180_v20 = vadd.f32 %v1463_v16, %v179_v19 }
  0xb0   :  { %v184_v23 = vsel %vm183_vm3, %v1463_v16, %v180_v20 }
  0xb1   :  { %v189_v26 = vsel %vm186_vm4, %v188_v24, %v184_v23 }
  0xb2   :  { %v192_v28 = vmul.f32 0.0, %v189_v26 }
 0x10f   :  { %v195_v25 = vpop.permute.xlu0 %194 }
 0x110   :  { %v197_v27 = vmul.f32 %v195_v25, %v189_v26 }
 0x112   :  { %199 = vrot.lane.b32.xlu0 %v197_v27, %s1696_s14 }
 0x184   :  { %v200_v29 = vpop.permute.xlu0 %199 }
 0x185   :  { %v1809_v30 = vadd.f32 %v200_v29, %v192_v28 }
 0x187   :  { %1464 = vtanh.f32 %v1809_v30  ;;  %v259_v24 = vrot.slane %v1809_v30, 4 }
 0x18d   :  { %v1465_v31 = vpop.eup %1464 }
 0x18e   :  { %205 = vrot.lane.b32.xlu1 %v1465_v31, %s1696_s14 }
 0x200   :  { %v206_v36 = vpop.permute.xlu1 %205 }
 0x201   :  { %v208_v37 = vmul.f32 %v206_v36, %v189_v26 }
 0x203   :  { %210 = vrot.lane.b32.xlu1 %v208_v37, %s1697_s15 }
 0x275   :  { %v211_v42 = vpop.permute.xlu1 %210 }
 0x276   :  { %1408 = vmatmul.msk.f32.vlgmr.msra.gmra.mxu2 %vm147_vm5, %v211_v42  ;;  %1410 = vmatmul.msk.f32.vlgmr.msra.gmra.mxu3 %vm147_vm5, %v211_v42 }
 0x277   :  { %523 = vmatpush.msra.mxu2 %v1761_v0  ;;  %587 = vmatpush.msra.mxu3 %v1813_v32 }
 0x279   :  { %524 = vmatpush.msra.mxu2 %v1766_v1  ;;  %588 = vmatpush.msra.mxu3 %v1815_v33 }
 0x27b   :  { %525 = vmatpush.msra.mxu2 %v1778_v4  ;;  %589 = vmatpush.msra.mxu3 %v1818_v34 }
 0x27d   :  { %526 = vmatpush.msra.mxu2 %v1786_v5  ;;  %590 = vmatpush.msra.mxu3 %v1821_v35 }
 0x2f9   :  { %v231_v43 = vpop.f32.mrf.mxu2  ;;  %v295_v46 = vpop.f32.mrf.mxu3 }
 0x2fa   :  { %v235_v44 = vrot.slane %v231_v43, 4  ;;  %v296_v48 = vadd.f32 %v1872_v45, %v295_v46 }
 0x2fc   :  { %v237_v47 = vadd.f32 %v235_v44, %v1804_v9  ;;  %v318_v50 = vadd.f32 %v315_v49, %v296_v48 }
 0x2fe   :  { %1466 = vtanh.f32 %v237_v47  ;;  %v1409_v53 = vmul.f32 -1.442695, %v237_v47  ;;  %v1411_v54 = vmul.f32 -1.442695, %v318_v50  ;;  %v98_v47 = vld [vmem:[%s2104_s0 + $0x8] sm:$0xff] }
 0x2ff   :  { %1468 = vtanh.f32 %v318_v50  ;;  %1404 = vmatmul.msk.f32.gmra.mxu0 %vm105_vm0, %v98_v47 }
 0x300   :  { %1470 = vpow2.f32 %v1409_v53 }
 0x301   :  { %1472 = vpow2.f32 %v1411_v54 }
 0x304   :  { %v1467_v51 = vpop.eup %1466 }
 0x305   :  { %263 = vrot.lane.b32.xlu2 %v1467_v51, %s1696_s14  ;;  %v1469_v52 = vpop.eup %1468 }
 0x306   :  { %v1471_v55 = vpop.eup %1470 }
 0x307   :  { %v241_v56 = vadd.f32 1.0, %v1471_v55  ;;  %v1473_v57 = vpop.eup %1472 }
 0x308   :  { %v322_v58 = vadd.f32 1.0, %v1473_v57 }
 0x309   :  { %1474 = vrcp.f32 %v241_v56  ;;  %v253_v8 = vand.u32 2147483648, %v241_v56  ;;  %vm247_vm7 = vweird.f32 %v241_v56  ;;  %v251_v9 = vand.u32 2147483647, %v241_v56 }
 0x30a   :  { %1476 = vrcp.f32 %v322_v58  ;;  %v334_v17 = vand.u32 2147483648, %v322_v58  ;;  %vm328_vm11 = vweird.f32 %v322_v58  ;;  %v332_v18 = vand.u32 2147483647, %v322_v58 }
 0x30b   :  { %v254_v12 = vor.u32 1.1754944e-38, %v253_v8  ;;  %vm252_vm9 = vcmp.eq.f32.partialorder %v251_v9, 8.507059e+37 }
 0x30c   :  { %v335_v20 = vor.u32 1.1754944e-38, %v334_v17  ;;  %vm333_vm13 = vcmp.eq.f32.partialorder %v332_v18, 8.507059e+37 }
 0x30d   :  { %341 = vrot.lane.b32.xlu2 %v1469_v52, %s1696_s14 }
 0x30f   :  { %v1475_v59 = vpop.eup %1474 }
 0x310   :  { %v243_v60 = vmul.f32 %v1475_v59, %v241_v56  ;;  %v1477_v62 = vpop.eup %1476  ;;  %vm248_vm6 = vweird.f32 %v1475_v59 }
 0x311   :  { %v324_v2 = vmul.f32 %v1477_v62, %v322_v58  ;;  %vm249_vm8 = vmor %vm247_vm7, %vm248_vm6  ;;  %vm329_vm10 = vweird.f32 %v1477_v62 }
 0x312   :  { %v244_v61 = vsub.f32 1.0, %v243_v60  ;;  %vm330_vm12 = vmor %vm328_vm11, %vm329_vm10 }
 0x313   :  { %v325_v6 = vsub.f32 1.0, %v324_v2 }
 0x314   :  { %v245_v63 = vmul.f32 %v1475_v59, %v244_v61 }
 0x315   :  { %v326_v11 = vmul.f32 %v1477_v62, %v325_v6 }
 0x316   :  { %v246_v3 = vadd.f32 %v1475_v59, %v245_v63 }
 0x317   :  { %v327_v16 = vadd.f32 %v1477_v62, %v326_v11 }
 0x318   :  { %v250_v10 = vsel %vm249_vm8, %v1475_v59, %v246_v3 }
 0x319   :  { %v255_v14 = vsel %vm252_vm9, %v254_v12, %v250_v10  ;;  %v331_v19 = vsel %vm330_vm12, %v1477_v62, %v327_v16 }
 0x31a   :  { %v336_v21 = vsel %vm333_vm13, %v335_v20, %v331_v19  ;;  %v261_v25 = vmul.f32 %v259_v24, %v255_v14 }
 0x31b   :  { %v339_v28 = vmul.f32 0.0, %v336_v21 }
 0x35f   :  { %v264_v13 = vpop.permute.xlu2 %263 }
 0x360   :  { %v266_v15 = vmul.f32 %v264_v13, %v255_v14 }
 0x362   :  { %268 = vrot.lane.b32.xlu0 %v266_v15, %s1696_s14 }
 0x367   :  { %v342_v22 = vpop.permute.xlu2 %341 }
 0x368   :  { %v344_v23 = vmul.f32 %v342_v22, %v336_v21 }
 0x36a   :  { %346 = vrot.lane.b32.xlu1 %v344_v23, %s1696_s14 }
 0x37c   :  { %v138_v50 = vpop.f32.mrf.mxu0 }
 0x37d   :  { %v1911_v51 = vadd.f32 %v1801_v7, %v138_v50 }
 0x3d4   :  { %v269_v26 = vpop.permute.xlu0 %268 }
 0x3d5   :  { %v1881_v27 = vadd.f32 %v269_v26, %v261_v25 }
 0x3d7   :  { %1478 = vtanh.f32 %v1881_v27 }
 0x3dc   :  { %v347_v29 = vpop.permute.xlu1 %346 }
 0x3dd   :  { %v1479_v31 = vpop.eup %1478  ;;  %v1884_v36 = vadd.f32 %v347_v29, %v339_v28 }
 0x3de   :  { %274 = vrot.lane.b32.xlu2 %v1479_v31, %s1696_s14 }
 0x3df   :  { %1480 = vtanh.f32 %v1884_v36 }
 0x3e5   :  { %v1481_v37 = vpop.eup %1480 }
 0x3e6   :  { %352 = vrot.lane.b32.xlu0 %v1481_v37, %s1696_s14 }
 0x438   :  { %v275_v42 = vpop.permute.xlu2 %274 }
 0x439   :  { %v277_v30 = vmul.f32 %v275_v42, %v255_v14  ;;  %v404_v42 = vrot.slane %v1881_v27, 4 }
 0x43b   :  { %v357_v43 = vrot.slane %v277_v30, 4 }
 0x43d   :  { %358 = vrot.lane.b32.xlu1 %v357_v43, %s1697_s15 }
 0x458   :  { %v353_v44 = vpop.permute.xlu0 %352 }
 0x459   :  { %v355_v46 = vmul.f32 %v353_v44, %v336_v21 }
 0x45b   :  { %444 = vrot.lane.b32.xlu2 %v355_v46, %s1697_s15 }
 0x4af   :  { %v359_v48 = vpop.permute.xlu1 %358 }
 0x4b0   :  { %1412 = vmatmul.msk.f32.vlgmr.msrb.gmra.mxu2 %vm147_vm5, %v359_v48  ;;  %1414 = vmatmul.msk.f32.vlgmr.msrb.gmra.mxu3 %vm147_vm5, %v359_v48 }
 0x4b1   :  { %676 = vmatpush.msrb.mxu2 %v1761_v0  ;;  %737 = vmatpush.msrb.mxu3 %v1813_v32 }
 0x4b3   :  { %677 = vmatpush.msrb.mxu2 %v1766_v1  ;;  %738 = vmatpush.msrb.mxu3 %v1815_v33 }
 0x4b5   :  { %v445_v49 = vpop.permute.xlu2 %444  ;;  %678 = vmatpush.msrb.mxu2 %v1778_v4  ;;  %739 = vmatpush.msrb.mxu3 %v1818_v34 }
 0x4b6   :  { %1415 = vmatmul.msk.f32.vlgmr.msra.gmra.mxu1 %vm147_vm5, %v445_v49 }
 0x4b7   :  { %679 = vmatpush.msrb.mxu2 %v1786_v5  ;;  %740 = vmatpush.msrb.mxu3 %v1821_v35 }
 0x4b8   :  { %825 = vmatpush.msra.mxu1 %v1761_v0 }
 0x4ba   :  { %826 = vmatpush.msra.mxu1 %v1766_v1 }
 0x4bc   :  { %827 = vmatpush.msra.mxu1 %v1778_v4 }
 0x4be   :  { %828 = vmatpush.msra.mxu1 %v1786_v5 }
 0x533   :  { %v379_v52 = vpop.f32.mrf.mxu2  ;;  %v440_v53 = vpop.f32.mrf.mxu3 }
 0x534   :  { %v382_v54 = vadd.f32 %v379_v52, %v1911_v51  ;;  %v441_v55 = vadd.f32 %v1872_v45, %v440_v53  ;;  %v465_v56 = vpop.f32.mrf.mxu1 }
 0x536   :  { %1482 = vtanh.f32 %v382_v54  ;;  %v468_v57 = vadd.f32 %v465_v56, %v441_v55  ;;  %v1413_v60 = vmul.f32 -1.442695, %v382_v54 }
 0x538   :  { %1484 = vtanh.f32 %v468_v57  ;;  %v1416_v61 = vmul.f32 -1.442695, %v468_v57 }
 0x539   :  { %1486 = vpow2.f32 %v1413_v60 }
 0x53a   :  { %1488 = vpow2.f32 %v1416_v61 }
 0x53c   :  { %v1483_v58 = vpop.eup %1482 }
 0x53d   :  { %408 = vrot.lane.b32.xlu0 %v1483_v58, %s1696_s14 }
 0x53e   :  { %v1485_v59 = vpop.eup %1484 }
 0x53f   :  { %491 = vrot.lane.b32.xlu1 %v1485_v59, %s1696_s14  ;;  %v1487_v62 = vpop.eup %1486 }
 0x540   :  { %v1489_v63 = vpop.eup %1488  ;;  %v386_v2 = vadd.f32 1.0, %v1487_v62 }
 0x541   :  { %v472_v3 = vadd.f32 1.0, %v1489_v63 }
 0x542   :  { %1490 = vrcp.f32 %v386_v2  ;;  %v398_v16 = vand.u32 2147483648, %v386_v2  ;;  %vm392_vm15 = vweird.f32 %v386_v2  ;;  %v396_v17 = vand.u32 2147483647, %v386_v2 }
 0x543   :  { %1492 = vrcp.f32 %v472_v3  ;;  %v484_v20 = vand.u32 2147483648, %v472_v3  ;;  %vm478_vm3 = vweird.f32 %v472_v3  ;;  %v482_v22 = vand.u32 2147483647, %v472_v3 }
 0x544   :  { %v399_v21 = vor.u32 1.1754944e-38, %v398_v16  ;;  %vm397_vm4 = vcmp.eq.f32.partialorder %v396_v17, 8.507059e+37 }
 0x545   :  { %v485_v28 = vor.u32 1.1754944e-38, %v484_v20  ;;  %vm483_vm7 = vcmp.eq.f32.partialorder %v482_v22, 8.507059e+37 }
 0x548   :  { %v1491_v6 = vpop.eup %1490 }
 0x549   :  { %v1493_v8 = vpop.eup %1492  ;;  %v388_v9 = vmul.f32 %v1491_v6, %v386_v2  ;;  %vm393_vm14 = vweird.f32 %v1491_v6 }
 0x54a   :  { %v474_v10 = vmul.f32 %v1493_v8, %v472_v3  ;;  %vm394_vm1 = vmor %vm392_vm15, %vm393_vm14  ;;  %vm479_vm2 = vweird.f32 %v1493_v8 }
 0x54b   :  { %v389_v11 = vsub.f32 1.0, %v388_v9  ;;  %vm480_vm6 = vmor %vm478_vm3, %vm479_vm2 }
 0x54c   :  { %v475_v12 = vsub.f32 1.0, %v474_v10 }
 0x54d   :  { %v390_v13 = vmul.f32 %v1491_v6, %v389_v11 }
 0x54e   :  { %v476_v14 = vmul.f32 %v1493_v8, %v475_v12 }
 0x54f   :  { %v391_v15 = vadd.f32 %v1491_v6, %v390_v13 }
 0x550   :  { %v477_v18 = vadd.f32 %v1493_v8, %v476_v14 }
 0x551   :  { %v395_v19 = vsel %vm394_vm1, %v1491_v6, %v391_v15 }
 0x552   :  { %v400_v24 = vsel %vm397_vm4, %v399_v21, %v395_v19  ;;  %v481_v25 = vsel %vm480_vm6, %v1493_v8, %v477_v18 }
 0x553   :  { %v486_v31 = vsel %vm483_vm7, %v485_v28, %v481_v25  ;;  %v406_v30 = vmul.f32 %v404_v42, %v400_v24 }
 0x554   :  { %v489_v47 = vmul.f32 %v486_v31, %v1884_v36 }
 0x5af   :  { %v409_v23 = vpop.permute.xlu0 %408 }
 0x5b0   :  { %v411_v26 = vmul.f32 %v409_v23, %v400_v24 }
 0x5b1   :  { %v492_v29 = vpop.permute.xlu1 %491 }
 0x5b2   :  { %413 = vrot.lane.b32.xlu2 %v411_v26, %s1696_s14  ;;  %v494_v37 = vmul.f32 %v492_v29, %v486_v31 }
 0x5b4   :  { %496 = vrot.lane.b32.xlu0 %v494_v37, %s1696_s14 }
 0x60c   :  { %v414_v43 = vpop.permute.xlu2 %413 }
 0x60d   :  { %v1920_v44 = vadd.f32 %v414_v43, %v406_v30 }
 0x60f   :  { %1494 = vtanh.f32 %v1920_v44 }
 0x615   :  { %v1495_v46 = vpop.eup %1494 }
 0x616   :  { %419 = vrot.lane.b32.xlu1 %v1495_v46, %s1696_s14 }
 0x626   :  { %v497_v48 = vpop.permute.xlu0 %496 }
 0x627   :  { %v1925_v49 = vadd.f32 %v497_v48, %v489_v47  ;;  %v556_v47 = vrot.slane %v1920_v44, 4 }
 0x629   :  { %1496 = vtanh.f32 %v1925_v49 }
 0x62f   :  { %v1497_v50 = vpop.eup %1496 }
 0x630   :  { %502 = vrot.lane.b32.xlu2 %v1497_v50, %s1696_s14 }
 0x688   :  { %v420_v27 = vpop.permute.xlu1 %419 }
 0x689   :  { %v422_v52 = vmul.f32 %v420_v27, %v400_v24 }
 0x68a   :  { %v503_v53 = vpop.permute.xlu2 %502 }
 0x68b   :  { %507 = vrot.lane.b32.xlu0 %v422_v52, %s1697_s15  ;;  %v505_v54 = vmul.f32 %v503_v53, %v486_v31 }
 0x68d   :  { %596 = vrot.lane.b32.xlu1 %v505_v54, %s1697_s15 }
 0x6fd   :  { %v508_v55 = vpop.permute.xlu0 %507 }
 0x6fe   :  { %1417 = vmatmul.msk.f32.vlgmr.msra.gmra.mxu2 %vm147_vm5, %v508_v55  ;;  %1419 = vmatmul.msk.f32.vlgmr.msra.gmra.mxu3 %vm147_vm5, %v508_v55 }
 0x6ff   :  { %914 = vmatpush.msra.mxu3 %v1830_v38  ;;  %889 = vmatpush.msra.mxu2 %v1813_v32  ;;  %v597_v36 = vpop.permute.xlu1 %596 }
 0x700   :  { %1420 = vmatmul.msk.f32.vlgmr.msrb.gmra.mxu1 %vm147_vm5, %v597_v36 }
 0x701   :  { %915 = vmatpush.msra.mxu3 %v1832_v39  ;;  %890 = vmatpush.msra.mxu2 %v1815_v33 }
 0x702   :  { %1039 = vmatpush.msrb.mxu1 %v1813_v32 }
 0x703   :  { %916 = vmatpush.msra.mxu3 %v1836_v40  ;;  %891 = vmatpush.msra.mxu2 %v1818_v34 }
 0x704   :  { %1040 = vmatpush.msrb.mxu1 %v1815_v33 }
 0x705   :  { %917 = vmatpush.msra.mxu3 %v1840_v41  ;;  %892 = vmatpush.msra.mxu2 %v1821_v35 }
 0x706   :  { %1041 = vmatpush.msrb.mxu1 %v1818_v34 }
 0x708   :  { %1042 = vmatpush.msrb.mxu1 %v1821_v35 }
 0x77d   :  { %v617_v60 = vpop.f32.mrf.mxu1 }
 0x781   :  { %v528_v56 = vpop.f32.mrf.mxu2  ;;  %v592_v57 = vpop.f32.mrf.mxu3 }
 0x782   :  { %v532_v58 = vrot.slane %v528_v56, 4  ;;  %v593_v59 = vadd.f32 %v1872_v45, %v592_v57 }
 0x784   :  { %v534_v61 = vadd.f32 %v532_v58, %v1911_v51  ;;  %v620_v62 = vadd.f32 %v617_v60, %v593_v59  ;;  %v99_v59 = vld [vmem:[%s2104_s0 + $0x10] sm:$0xff]  ;;  %v100_v60 = vld [vmem:[%s2104_s0 + $0x18] sm:$0xff] }
 0x785   :  { %1405 = vmatmul.msk.f32.gmra.mxu0 %vm105_vm0, %v99_v59 }
 0x786   :  { %1498 = vtanh.f32 %v534_v61  ;;  %v1418_v3 = vmul.f32 -1.442695, %v534_v61  ;;  %v1421_v10 = vmul.f32 -1.442695, %v620_v62 }
 0x787   :  { %1500 = vtanh.f32 %v620_v62 }
 0x788   :  { %1502 = vpow2.f32 %v1418_v3 }
 0x78c   :  { %v1499_v63 = vpop.eup %1498 }
 0x78d   :  { %v1501_v2 = vpop.eup %1500  ;;  %560 = vrot.lane.b32.xlu2 %v1499_v63, %s1696_s14  ;;  %1406 = vmatmul.msk.f32.gmra.mxu0 %vm105_vm0, %v100_v60 }
 0x78e   :  { %643 = vrot.lane.b32.xlu0 %v1501_v2, %s1696_s14  ;;  %v1503_v6 = vpop.eup %1502 }
 0x78f   :  { %v538_v8 = vadd.f32 1.0, %v1503_v6 }
 0x791   :  { %1504 = vrcp.f32 %v538_v8  ;;  %v550_v16 = vand.u32 2147483648, %v538_v8  ;;  %vm544_vm9 = vweird.f32 %v538_v8  ;;  %v548_v17 = vand.u32 2147483647, %v538_v8 }
 0x792   :  { %1506 = vpow2.f32 %v1421_v10 }
 0x793   :  { %v551_v19 = vor.u32 1.1754944e-38, %v550_v16  ;;  %vm549_vm11 = vcmp.eq.f32.partialorder %v548_v17, 8.507059e+37 }
 0x797   :  { %v1505_v9 = vpop.eup %1504 }
 0x798   :  { %v540_v11 = vmul.f32 %v1505_v9, %v538_v8  ;;  %v1507_v13 = vpop.eup %1506  ;;  %vm545_vm8 = vweird.f32 %v1505_v9 }
 0x799   :  { %v624_v14 = vadd.f32 1.0, %v1507_v13  ;;  %vm546_vm10 = vmor %vm544_vm9, %vm545_vm8 }
 0x79a   :  { %v541_v12 = vsub.f32 1.0, %v540_v11 }
 0x79b   :  { %1508 = vrcp.f32 %v624_v14  ;;  %v636_v29 = vand.u32 2147483648, %v624_v14  ;;  %vm630_vm13 = vweird.f32 %v624_v14  ;;  %v634_v31 = vand.u32 2147483647, %v624_v14 }
 0x79c   :  { %v542_v51 = vmul.f32 %v1505_v9, %v541_v12 }
 0x79d   :  { %v637_v42 = vor.u32 1.1754944e-38, %v636_v29  ;;  %vm635_vm15 = vcmp.eq.f32.partialorder %v634_v31, 8.507059e+37 }
 0x79e   :  { %v543_v15 = vadd.f32 %v1505_v9, %v542_v51 }
 0x7a0   :  { %v547_v18 = vsel %vm546_vm10, %v1505_v9, %v543_v15 }
 0x7a1   :  { %v552_v20 = vsel %vm549_vm11, %v551_v19, %v547_v18  ;;  %v1509_v23 = vpop.eup %1508 }
 0x7a2   :  { %v626_v24 = vmul.f32 %v1509_v23, %v624_v14  ;;  %vm631_vm12 = vweird.f32 %v1509_v23  ;;  %v558_v48 = vmul.f32 %v556_v47, %v552_v20 }
 0x7a3   :  { %vm632_vm14 = vmor %vm630_vm13, %vm631_vm12 }
 0x7a4   :  { %v627_v25 = vsub.f32 1.0, %v626_v24 }
 0x7a6   :  { %v628_v26 = vmul.f32 %v1509_v23, %v627_v25 }
 0x7a8   :  { %v629_v28 = vadd.f32 %v1509_v23, %v628_v26 }
 0x7aa   :  { %v633_v37 = vsel %vm632_vm14, %v1509_v23, %v629_v28 }
 0x7ab   :  { %v638_v43 = vsel %vm635_vm15, %v637_v42, %v633_v37 }
 0x7ac   :  { %v641_v27 = vmul.f32 %v638_v43, %v1925_v49 }
 0x7e7   :  { %v561_v21 = vpop.permute.xlu2 %560 }
 0x7e8   :  { %v563_v22 = vmul.f32 %v561_v21, %v552_v20 }
 0x7ea   :  { %565 = vrot.lane.b32.xlu1 %v563_v22, %s1696_s14 }
 0x800   :  { %v644_v30 = vpop.permute.xlu0 %643 }
 0x801   :  { %v646_v46 = vmul.f32 %v644_v30, %v638_v43 }
 0x803   :  { %648 = vrot.lane.b32.xlu2 %v646_v46, %s1696_s14 }
 0x85c   :  { %v566_v50 = vpop.permute.xlu1 %565 }
 0x85d   :  { %v1954_v52 = vadd.f32 %v566_v50, %v558_v48  ;;  %v649_v53 = vpop.permute.xlu2 %648 }
 0x85e   :  { %v1956_v54 = vadd.f32 %v649_v53, %v641_v27 }
 0x85f   :  { %1510 = vtanh.f32 %v1954_v52 }
 0x860   :  { %1512 = vtanh.f32 %v1956_v54 }
 0x865   :  { %v1511_v55 = vpop.eup %1510 }
 0x866   :  { %v1513_v36 = vpop.eup %1512  ;;  %571 = vrot.lane.b32.xlu0 %v1511_v55, %s1696_s14 }
 0x867   :  { %654 = vrot.lane.b32.xlu1 %v1513_v36, %s1696_s14 }
 0x8d8   :  { %v572_v44 = vpop.permute.xlu0 %571 }
 0x8d9   :  { %v574_v56 = vmul.f32 %v572_v44, %v552_v20  ;;  %v655_v57 = vpop.permute.xlu1 %654  ;;  %v706_v44 = vrot.slane %v1954_v52, 4 }
 0x8da   :  { %v657_v58 = vmul.f32 %v655_v57, %v638_v43 }
 0x8db   :  { %v659_v49 = vrot.slane %v574_v56, 4 }
 0x8dc   :  { %746 = vrot.lane.b32.xlu0 %v657_v58, %s1697_s15 }
 0x8dd   :  { %660 = vrot.lane.b32.xlu2 %v659_v49, %s1697_s15 }
 0x937   :  { %v661_v61 = vpop.permute.xlu2 %660 }
 0x938   :  { %1422 = vmatmul.msk.f32.vlgmr.msrb.gmra.mxu2 %vm147_vm5, %v661_v61  ;;  %1424 = vmatmul.msk.f32.vlgmr.msrb.gmra.mxu3 %vm147_vm5, %v661_v61 }
 0x939   :  { %1064 = vmatpush.msrb.mxu2 %v1830_v38  ;;  %1127 = vmatpush.msrb.mxu3 %v1761_v0  ;;  %v141_v0 = vpop.f32.mrf.mxu0 }
 0x93b   :  { %1065 = vmatpush.msrb.mxu2 %v1832_v39  ;;  %1128 = vmatpush.msrb.mxu3 %v1766_v1  ;;  %v1988_v1 = vadd.f32 %v1801_v7, %v141_v0 }
 0x93d   :  { %1066 = vmatpush.msrb.mxu2 %v1836_v40  ;;  %1129 = vmatpush.msrb.mxu3 %v1778_v4 }
 0x93f   :  { %1067 = vmatpush.msrb.mxu2 %v1840_v41  ;;  %1130 = vmatpush.msrb.mxu3 %v1786_v5 }
 0x941   :  { %v1991_v5 = vpop.f32.mrf.mxu0 }
 0x94e   :  { %v747_v62 = vpop.permute.xlu0 %746 }
 0x94f   :  { %1425 = vmatmul.msk.f32.vlgmr.msrb.gmra.mxu0 %vm147_vm5, %v747_v62 }
 0x950   :  { %1191 = vmatpush.msrb.mxu0 %v1813_v32 }
 0x952   :  { %1192 = vmatpush.msrb.mxu0 %v1815_v33 }
 0x954   :  { %1193 = vmatpush.msrb.mxu0 %v1818_v34 }
 0x956   :  { %1194 = vmatpush.msrb.mxu0 %v1821_v35 }
 0x9bb   :  { %v681_v4 = vpop.f32.mrf.mxu2  ;;  %v742_v3 = vpop.f32.mrf.mxu3 }
 0x9bc   :  { %v684_v63 = vadd.f32 %v681_v4, %v1988_v1  ;;  %v743_v6 = vadd.f32 %v1872_v45, %v742_v3 }
 0x9be   :  { %1514 = vtanh.f32 %v684_v63  ;;  %v1423_v11 = vmul.f32 -1.442695, %v684_v63 }
 0x9c4   :  { %v1515_v2 = vpop.eup %1514 }
 0x9c5   :  { %710 = vrot.lane.b32.xlu1 %v1515_v2, %s1696_s14 }
 0x9cc   :  { %v767_v8 = vpop.f32.mrf.mxu0 }
 0x9cd   :  { %v770_v9 = vadd.f32 %v767_v8, %v743_v6 }
 0x9cf   :  { %1516 = vtanh.f32 %v770_v9  ;;  %v1426_v7 = vmul.f32 -1.442695, %v770_v9 }
 0x9d1   :  { %1518 = vpow2.f32 %v1426_v7 }
 0x9d2   :  { %1520 = vpow2.f32 %v1423_v11 }
 0x9d5   :  { %v1517_v10 = vpop.eup %1516 }
 0x9d6   :  { %793 = vrot.lane.b32.xlu2 %v1517_v10, %s1696_s14 }
 0x9d7   :  { %v1519_v12 = vpop.eup %1518 }
 0x9d8   :  { %v774_v51 = vadd.f32 1.0, %v1519_v12  ;;  %v1521_v13 = vpop.eup %1520 }
 0x9d9   :  { %v688_v14 = vadd.f32 1.0, %v1521_v13 }
 0x9da   :  { %1522 = vrcp.f32 %v774_v51  ;;  %v786_v23 = vand.u32 2147483648, %v774_v51  ;;  %vm780_vm1 = vweird.f32 %v774_v51  ;;  %v784_v24 = vand.u32 2147483647, %v774_v51 }
 0x9db   :  { %1524 = vrcp.f32 %v688_v14  ;;  %v700_v30 = vand.u32 2147483648, %v688_v14  ;;  %vm694_vm6 = vweird.f32 %v688_v14  ;;  %v698_v43 = vand.u32 2147483647, %v688_v14 }
 0x9dc   :  { %v787_v28 = vor.u32 1.1754944e-38, %v786_v23  ;;  %vm785_vm3 = vcmp.eq.f32.partialorder %v784_v24, 8.507059e+37 }
 0x9dd   :  { %v701_v47 = vor.u32 1.1754944e-38, %v700_v30  ;;  %vm699_vm8 = vcmp.eq.f32.partialorder %v698_v43, 8.507059e+37 }
 0x9e0   :  { %v1523_v15 = vpop.eup %1522 }
 0x9e1   :  { %v776_v16 = vmul.f32 %v1523_v15, %v774_v51  ;;  %v1525_v17 = vpop.eup %1524  ;;  %vm781_vm0 = vweird.f32 %v1523_v15 }
 0x9e2   :  { %v690_v19 = vmul.f32 %v1525_v17, %v688_v14  ;;  %vm782_vm2 = vmor %vm780_vm1, %vm781_vm0  ;;  %vm695_vm4 = vweird.f32 %v1525_v17 }
 0x9e3   :  { %v777_v18 = vsub.f32 1.0, %v776_v16  ;;  %vm696_vm7 = vmor %vm694_vm6, %vm695_vm4 }
 0x9e4   :  { %v691_v21 = vsub.f32 1.0, %v690_v19 }
 0x9e5   :  { %v778_v20 = vmul.f32 %v1523_v15, %v777_v18 }
 0x9e6   :  { %v692_v25 = vmul.f32 %v1525_v17, %v691_v21 }
 0x9e7   :  { %v779_v22 = vadd.f32 %v1523_v15, %v778_v20 }
 0x9e8   :  { %v693_v37 = vadd.f32 %v1525_v17, %v692_v25 }
 0x9e9   :  { %v783_v26 = vsel %vm782_vm2, %v1523_v15, %v779_v22 }
 0x9ea   :  { %v788_v31 = vsel %vm785_vm3, %v787_v28, %v783_v26  ;;  %v697_v46 = vsel %vm696_vm7, %v1525_v17, %v693_v37 }
 0x9eb   :  { %v702_v50 = vsel %vm699_vm8, %v701_v47, %v697_v46  ;;  %v791_v53 = vmul.f32 %v788_v31, %v1956_v54 }
 0x9ec   :  { %v708_v56 = vmul.f32 %v706_v44, %v702_v50 }
 0xa30   :  { %v794_v29 = vpop.permute.xlu2 %793 }
 0xa31   :  { %v796_v42 = vmul.f32 %v794_v29, %v788_v31 }
 0xa33   :  { %798 = vrot.lane.b32.xlu1 %v796_v42, %s1696_s14 }
 0xa37   :  { %v711_v48 = vpop.permute.xlu1 %710 }
 0xa38   :  { %v713_v27 = vmul.f32 %v711_v48, %v702_v50 }
 0xa3a   :  { %715 = vrot.lane.b32.xlu0 %v713_v27, %s1696_s14 }
 0xaa5   :  { %v799_v55 = vpop.permute.xlu1 %798 }
 0xaa6   :  { %v1999_v36 = vadd.f32 %v799_v55, %v791_v53 }
 0xaa8   :  { %1526 = vtanh.f32 %v1999_v36 }
 0xaac   :  { %v716_v57 = vpop.permute.xlu0 %715 }
 0xaad   :  { %v2003_v58 = vadd.f32 %v716_v57, %v708_v56 }
 0xaae   :  { %v1527_v49 = vpop.eup %1526 }
 0xaaf   :  { %1528 = vtanh.f32 %v2003_v58  ;;  %804 = vrot.lane.b32.xlu0 %v1527_v49, %s1696_s14  ;;  %v858_v42 = vrot.slane %v2003_v58, 4 }
 0xab5   :  { %v1529_v59 = vpop.eup %1528 }
 0xab6   :  { %721 = vrot.lane.b32.xlu2 %v1529_v59, %s1696_s14  ;;  %v1586_v59 = vld [vmem:[%s2107_s3] ss:$0 sm:$0xff] }
 0xb10   :  { %v722_v54 = vpop.permute.xlu2 %721 }
 0xb11   :  { %v724_v60 = vmul.f32 %v722_v54, %v702_v50  ;;  %v2050_v54 = vadd.f32 %v1586_v59, %v1991_v5 }
 0xb13   :  { %809 = vrot.lane.b32.xlu1 %v724_v60, %s1697_s15 }
 0xb21   :  { %v805_v61 = vpop.permute.xlu0 %804 }
 0xb22   :  { %v807_v62 = vmul.f32 %v805_v61, %v788_v31 }
 0xb24   :  { %898 = vrot.lane.b32.xlu2 %v807_v62, %s1697_s15 }
 0xb7e   :  { %v899_v52 = vpop.permute.xlu2 %898 }
 0xb7f   :  { %1430 = vmatmul.msk.f32.vlgmr.msra.gmra.mxu3 %vm147_vm5, %v899_v52 }
 0xb80   :  { %1305 = vmatpush.msra.mxu3 %v1830_v38 }
 0xb82   :  { %1306 = vmatpush.msra.mxu3 %v1832_v39 }
 0xb84   :  { %1307 = vmatpush.msra.mxu3 %v1836_v40 }
 0xb85   :  { %v810_v0 = vpop.permute.xlu1 %809 }
 0xb86   :  { %1427 = vmatmul.msk.f32.vlgmr.msra.gmra.mxu1 %vm147_vm5, %v810_v0  ;;  %1429 = vmatmul.msk.f32.vlgmr.msra.gmra.mxu2 %vm147_vm5, %v810_v0 }
 0xb87   :  { %1216 = vmatpush.msra.mxu1 %v1830_v38  ;;  %1280 = vmatpush.msra.mxu2 %v1813_v32 }
 0xb88   :  { %1308 = vmatpush.msra.mxu3 %v1840_v41 }
 0xb89   :  { %1217 = vmatpush.msra.mxu1 %v1832_v39  ;;  %1281 = vmatpush.msra.mxu2 %v1815_v33 }
 0xb8b   :  { %1218 = vmatpush.msra.mxu1 %v1836_v40  ;;  %1282 = vmatpush.msra.mxu2 %v1818_v34 }
 0xb8d   :  { %1219 = vmatpush.msra.mxu1 %v1840_v41  ;;  %1283 = vmatpush.msra.mxu2 %v1821_v35 }
 0xc02   :  { %v919_v3 = vpop.f32.mrf.mxu3 }
 0xc03   :  { %v830_v4 = vpop.f32.mrf.mxu1 }
 0xc04   :  { %v834_v63 = vrot.slane %v830_v4, 4 }
 0xc06   :  { %v836_v38 = vadd.f32 %v834_v63, %v1988_v1 }
 0xc08   :  { %1530 = vtanh.f32 %v836_v38  ;;  %v1428_v34 = vmul.f32 -1.442695, %v836_v38 }
 0xc09   :  { %v894_v32 = vpop.f32.mrf.mxu2 }
 0xc0a   :  { %v895_v2 = vadd.f32 %v1872_v45, %v894_v32 }
 0xc0c   :  { %v922_v39 = vadd.f32 %v919_v3, %v895_v2 }
 0xc0e   :  { %v1531_v6 = vpop.eup %1530  ;;  %1532 = vtanh.f32 %v922_v39  ;;  %v1431_v35 = vmul.f32 -1.442695, %v922_v39 }
 0xc0f   :  { %862 = vrot.lane.b32.xlu0 %v1531_v6, %s1696_s14  ;;  %1534 = vpow2.f32 %v1428_v34 }
 0xc10   :  { %1536 = vpow2.f32 %v1431_v35 }
 0xc14   :  { %v1533_v33 = vpop.eup %1532 }
 0xc15   :  { %945 = vrot.lane.b32.xlu1 %v1533_v33, %s1696_s14  ;;  %v1535_v40 = vpop.eup %1534 }
 0xc16   :  { %v840_v41 = vadd.f32 1.0, %v1535_v40  ;;  %v1537_v1 = vpop.eup %1536 }
 0xc17   :  { %v926_v8 = vadd.f32 1.0, %v1537_v1 }
 0xc18   :  { %1538 = vrcp.f32 %v840_v41  ;;  %v852_v15 = vand.u32 2147483648, %v840_v41  ;;  %vm846_vm10 = vweird.f32 %v840_v41  ;;  %v850_v16 = vand.u32 2147483647, %v840_v41 }
 0xc19   :  { %1540 = vrcp.f32 %v926_v8  ;;  %v938_v23 = vand.u32 2147483648, %v926_v8  ;;  %vm932_vm14 = vweird.f32 %v926_v8  ;;  %v936_v25 = vand.u32 2147483647, %v926_v8 }
 0xc1a   :  { %v853_v19 = vor.u32 1.1754944e-38, %v852_v15  ;;  %vm851_vm12 = vcmp.eq.f32.partialorder %v850_v16, 8.507059e+37 }
 0xc1b   :  { %v939_v28 = vor.u32 1.1754944e-38, %v938_v23  ;;  %vm937_vm0 = vcmp.eq.f32.partialorder %v936_v25, 8.507059e+37 }
 0xc1e   :  { %v1539_v9 = vpop.eup %1538 }
 0xc1f   :  { %v842_v10 = vmul.f32 %v1539_v9, %v840_v41  ;;  %v1541_v7 = vpop.eup %1540  ;;  %vm847_vm9 = vweird.f32 %v1539_v9 }
 0xc20   :  { %v928_v12 = vmul.f32 %v1541_v7, %v926_v8  ;;  %vm848_vm11 = vmor %vm846_vm10, %vm847_vm9  ;;  %vm933_vm13 = vweird.f32 %v1541_v7 }
 0xc21   :  { %v843_v11 = vsub.f32 1.0, %v842_v10  ;;  %vm934_vm15 = vmor %vm932_vm14, %vm933_vm13 }
 0xc22   :  { %v929_v13 = vsub.f32 1.0, %v928_v12 }
 0xc23   :  { %v844_v51 = vmul.f32 %v1539_v9, %v843_v11 }
 0xc24   :  { %v930_v17 = vmul.f32 %v1541_v7, %v929_v13 }
 0xc25   :  { %v845_v14 = vadd.f32 %v1539_v9, %v844_v51 }
 0xc26   :  { %v931_v20 = vadd.f32 %v1541_v7, %v930_v17 }
 0xc27   :  { %v849_v18 = vsel %vm848_vm11, %v1539_v9, %v845_v14 }
 0xc28   :  { %v854_v22 = vsel %vm851_vm12, %v853_v19, %v849_v18  ;;  %v935_v26 = vsel %vm934_vm15, %v1541_v7, %v931_v20 }
 0xc29   :  { %v940_v31 = vsel %vm937_vm0, %v939_v28, %v935_v26  ;;  %v860_v30 = vmul.f32 %v858_v42, %v854_v22 }
 0xc2a   :  { %v943_v48 = vmul.f32 %v940_v31, %v1999_v36 }
 0xc81   :  { %v863_v21 = vpop.permute.xlu0 %862 }
 0xc82   :  { %v865_v24 = vmul.f32 %v863_v21, %v854_v22 }
 0xc84   :  { %867 = vrot.lane.b32.xlu2 %v865_v24, %s1696_s14 }
 0xc87   :  { %v946_v29 = vpop.permute.xlu1 %945 }
 0xc88   :  { %v948_v37 = vmul.f32 %v946_v29, %v940_v31 }
 0xc8a   :  { %950 = vrot.lane.b32.xlu0 %v948_v37, %s1696_s14 }
 0xcde   :  { %v868_v43 = vpop.permute.xlu2 %867 }
 0xcdf   :  { %v2032_v46 = vadd.f32 %v868_v43, %v860_v30 }
 0xce1   :  { %1542 = vtanh.f32 %v2032_v46  ;;  %v1008_v23 = vrot.slane %v2032_v46, 4 }
 0xce7   :  { %v1543_v47 = vpop.eup %1542 }
 0xce8   :  { %873 = vrot.lane.b32.xlu1 %v1543_v47, %s1696_s14 }
 0xcfc   :  { %v951_v50 = vpop.permute.xlu0 %950 }
 0xcfd   :  { %v2037_v27 = vadd.f32 %v951_v50, %v943_v48 }
 0xcff   :  { %1544 = vtanh.f32 %v2037_v27 }
 0xd05   :  { %v1545_v53 = vpop.eup %1544 }
 0xd06   :  { %956 = vrot.lane.b32.xlu2 %v1545_v53, %s1696_s14 }
 0xd5a   :  { %v874_v55 = vpop.permute.xlu1 %873 }
 0xd5b   :  { %v876_v44 = vmul.f32 %v874_v55, %v854_v22 }
 0xd5d   :  { %v961_v56 = vrot.slane %v876_v44, 4 }
 0xd5f   :  { %962 = vrot.lane.b32.xlu0 %v961_v56, %s1697_s15 }
 0xd60   :  { %v957_v57 = vpop.permute.xlu2 %956 }
 0xd61   :  { %v959_v58 = vmul.f32 %v957_v57, %v940_v31  ;;  %v2078_v57 = vld [vmem:[%s2110_s6] ss:$0 sm:$0xff] }
 0xd63   :  { %1048 = vrot.lane.b32.xlu1 %v959_v58, %s1697_s15 }
 0xdd1   :  { %v963_v49 = vpop.permute.xlu0 %962 }
 0xdd2   :  { %1432 = vmatmul.msk.f32.vlgmr.msra.gmra.mxu0 %vm147_vm5, %v963_v49  ;;  %1434 = vmatmul.msk.f32.vlgmr.msrb.gmra.mxu1 %vm147_vm5, %v963_v49 }
 0xdd5   :  { %v1049_v36 = vpop.permute.xlu1 %1048 }
 0xdd6   :  { %1435 = vmatmul.msk.f32.vlgmr.msrb.gmra.mxu2 %vm147_vm5, %v1049_v36 }
 0xe4f   :  { %v983_v60 = vpop.f32.mrf.mxu0  ;;  %v1044_v62 = vpop.f32.mrf.mxu1 }
 0xe50   :  { %v986_v61 = vadd.f32 %v983_v60, %v2050_v54  ;;  %v1045_v0 = vadd.f32 %v1872_v45, %v1044_v62 }
 0xe52   :  { %1546 = vtanh.f32 %v986_v61  ;;  %v1433_v32 = vmul.f32 -1.442695, %v986_v61 }
 0xe58   :  { %v1547_v52 = vpop.eup %1546 }
 0xe59   :  { %1012 = vrot.lane.b32.xlu2 %v1547_v52, %s1696_s14  ;;  %v1069_v4 = vpop.f32.mrf.mxu2 }
 0xe5a   :  { %v1072_v63 = vadd.f32 %v1069_v4, %v1045_v0 }
 0xe5c   :  { %1548 = vtanh.f32 %v1072_v63  ;;  %v1436_v33 = vmul.f32 -1.442695, %v1072_v63 }
 0xe5d   :  { %1550 = vpow2.f32 %v1433_v32 }
 0xe62   :  { %v1549_v38 = vpop.eup %1548 }
 0xe63   :  { %1095 = vrot.lane.b32.xlu0 %v1549_v38, %s1696_s14  ;;  %v1551_v5 = vpop.eup %1550 }
 0xe64   :  { %v990_v2 = vadd.f32 1.0, %v1551_v5 }
 0xe66   :  { %1552 = vrcp.f32 %v990_v2  ;;  %v1002_v35 = vand.u32 2147483648, %v990_v2  ;;  %vm996_vm2 = vweird.f32 %v990_v2  ;;  %v1000_v40 = vand.u32 2147483647, %v990_v2 }
 0xe67   :  { %1554 = vpow2.f32 %v1436_v33 }
 0xe68   :  { %v1003_v1 = vor.u32 1.1754944e-38, %v1002_v35  ;;  %vm1001_vm4 = vcmp.eq.f32.partialorder %v1000_v40, 8.507059e+37 }
 0xe6c   :  { %v1553_v3 = vpop.eup %1552 }
 0xe6d   :  { %v992_v39 = vmul.f32 %v1553_v3, %v990_v2  ;;  %vm997_vm1 = vweird.f32 %v1553_v3  ;;  %v1555_v8 = vpop.eup %1554 }
 0xe6e   :  { %vm998_vm3 = vmor %vm996_vm2, %vm997_vm1  ;;  %v1076_v11 = vadd.f32 1.0, %v1555_v8 }
 0xe6f   :  { %v993_v6 = vsub.f32 1.0, %v992_v39 }
 0xe70   :  { %1556 = vrcp.f32 %v1076_v11  ;;  %v1088_v16 = vand.u32 2147483648, %v1076_v11  ;;  %vm1082_vm7 = vweird.f32 %v1076_v11  ;;  %v1086_v17 = vand.u32 2147483647, %v1076_v11 }
 0xe71   :  { %v994_v34 = vmul.f32 %v1553_v3, %v993_v6 }
 0xe72   :  { %v1089_v19 = vor.u32 1.1754944e-38, %v1088_v16  ;;  %vm1087_vm9 = vcmp.eq.f32.partialorder %v1086_v17, 8.507059e+37 }
 0xe73   :  { %v995_v45 = vadd.f32 %v1553_v3, %v994_v34 }
 0xe75   :  { %v999_v41 = vsel %vm998_vm3, %v1553_v3, %v995_v45 }
 0xe76   :  { %v1004_v9 = vsel %vm1001_vm4, %v1003_v1, %v999_v41  ;;  %v1557_v12 = vpop.eup %1556 }
 0xe77   :  { %v1078_v51 = vmul.f32 %v1557_v12, %v1076_v11  ;;  %vm1083_vm6 = vweird.f32 %v1557_v12  ;;  %v1010_v24 = vmul.f32 %v1008_v23, %v1004_v9 }
 0xe78   :  { %vm1084_vm8 = vmor %vm1082_vm7, %vm1083_vm6 }
 0xe79   :  { %v1079_v13 = vsub.f32 1.0, %v1078_v51 }
 0xe7b   :  { %v1080_v14 = vmul.f32 %v1557_v12, %v1079_v13 }
 0xe7d   :  { %v1081_v15 = vadd.f32 %v1557_v12, %v1080_v14 }
 0xe7f   :  { %v1085_v18 = vsel %vm1084_vm8, %v1557_v12, %v1081_v15 }
 0xe80   :  { %v1090_v21 = vsel %vm1087_vm9, %v1089_v19, %v1085_v18 }
 0xe81   :  { %v1093_v29 = vmul.f32 %v1090_v21, %v2037_v27 }
 0xeb3   :  { %v1013_v10 = vpop.permute.xlu2 %1012 }
 0xeb4   :  { %v1015_v7 = vmul.f32 %v1013_v10, %v1004_v9 }
 0xeb6   :  { %1017 = vrot.lane.b32.xlu1 %v1015_v7, %s1696_s14 }
 0xed5   :  { %v1096_v20 = vpop.permute.xlu0 %1095 }
 0xed6   :  { %v1098_v22 = vmul.f32 %v1096_v20, %v1090_v21 }
 0xed8   :  { %1100 = vrot.lane.b32.xlu2 %v1098_v22, %s1696_s14 }
 0xf28   :  { %v1018_v25 = vpop.permute.xlu1 %1017 }
 0xf29   :  { %v2059_v26 = vadd.f32 %v1018_v25, %v1010_v24 }
 0xf2b   :  { %1558 = vtanh.f32 %v2059_v26  ;;  %v1160_v14 = vrot.slane %v2059_v26, 4 }
 0xf31   :  { %v1559_v28 = vpop.eup %1558 }
 0xf32   :  { %1023 = vrot.lane.b32.xlu0 %v1559_v28, %s1696_s14  ;;  %v1101_v31 = vpop.permute.xlu2 %1100 }
 0xf33   :  { %v2064_v37 = vadd.f32 %v1101_v31, %v1093_v29 }
 0xf35   :  { %1560 = vtanh.f32 %v2064_v37 }
 0xf3b   :  { %v1561_v42 = vpop.eup %1560 }
 0xf3c   :  { %1106 = vrot.lane.b32.xlu1 %v1561_v42, %s1696_s14 }
 0xfa4   :  { %v1024_v30 = vpop.permute.xlu0 %1023 }
 0xfa5   :  { %v1026_v43 = vmul.f32 %v1024_v30, %v1004_v9 }
 0xfa7   :  { %1111 = vrot.lane.b32.xlu2 %v1026_v43, %s1697_s15 }
 0xfae   :  { %v1107_v46 = vpop.permute.xlu1 %1106 }
 0xfaf   :  { %v1109_v47 = vmul.f32 %v1107_v46, %v1090_v21 }
 0xfb1   :  { %1200 = vrot.lane.b32.xlu0 %v1109_v47, %s1697_s15 }
0x1001   :  { %v1112_v48 = vpop.permute.xlu2 %1111 }
0x1002   :  { %1437 = vmatmul.msk.f32.vlgmr.msrb.gmra.mxu3 %vm147_vm5, %v1112_v48  ;;  %1439 = vmatmul.msk.f32.vlgmr.msrb.gmra.mxu0 %vm147_vm5, %v1112_v48 }
0x1023   :  { %v1201_v50 = vpop.permute.xlu0 %1200 }
0x1024   :  { %1440 = vmatmul.msk.f32.vlgmr.msra.gmra.mxu1 %vm147_vm5, %v1201_v50 }
0x107f   :  { %v1196_v56 = vpop.f32.mrf.mxu0 }
0x1080   :  { %v1197_v58 = vadd.f32 %v2078_v57, %v1196_v56 }
0x1085   :  { %v1132_v27 = vpop.f32.mrf.mxu3 }
0x1086   :  { %v1136_v53 = vrot.slane %v1132_v27, 4 }
0x1088   :  { %v1138_v55 = vadd.f32 %v1136_v53, %v2050_v54 }
0x108a   :  { %1562 = vtanh.f32 %v1138_v55  ;;  %v1438_v60 = vmul.f32 -1.442695, %v1138_v55 }
0x1090   :  { %v1563_v44 = vpop.eup %1562 }
0x1091   :  { %1164 = vrot.lane.b32.xlu1 %v1563_v44, %s1696_s14 }
0x10a1   :  { %v1221_v49 = vpop.f32.mrf.mxu1 }
0x10a2   :  { %v1224_v36 = vadd.f32 %v1221_v49, %v1197_v58 }
0x10a4   :  { %1564 = vtanh.f32 %v1224_v36  ;;  %v1441_v54 = vmul.f32 -1.442695, %v1224_v36 }
0x10a5   :  { %1566 = vpow2.f32 %v1438_v60 }
0x10a6   :  { %1568 = vpow2.f32 %v1441_v54 }
0x10aa   :  { %v1565_v59 = vpop.eup %1564 }
0x10ab   :  { %1247 = vrot.lane.b32.xlu2 %v1565_v59, %s1696_s14  ;;  %v1567_v61 = vpop.eup %1566 }
0x10ac   :  { %v1569_v62 = vpop.eup %1568  ;;  %v1142_v52 = vadd.f32 1.0, %v1567_v61 }
0x10ad   :  { %v1228_v0 = vadd.f32 1.0, %v1569_v62 }
0x10ae   :  { %1570 = vrcp.f32 %v1142_v52  ;;  %v1154_v33 = vand.u32 2147483648, %v1142_v52  ;;  %vm1148_vm11 = vweird.f32 %v1142_v52  ;;  %v1152_v34 = vand.u32 2147483647, %v1142_v52 }
0x10af   :  { %1572 = vrcp.f32 %v1228_v0  ;;  %v1240_v35 = vand.u32 2147483648, %v1228_v0  ;;  %vm1234_vm14 = vweird.f32 %v1228_v0  ;;  %v1238_v41 = vand.u32 2147483647, %v1228_v0 }
0x10b0   :  { %v1155_v1 = vor.u32 1.1754944e-38, %v1154_v33  ;;  %vm1153_vm0 = vcmp.eq.f32.partialorder %v1152_v34, 8.507059e+37 }
0x10b1   :  { %v1241_v7 = vor.u32 1.1754944e-38, %v1240_v35  ;;  %vm1239_vm1 = vcmp.eq.f32.partialorder %v1238_v41, 8.507059e+37 }
0x10b4   :  { %v1571_v4 = vpop.eup %1570 }
0x10b5   :  { %v1573_v63 = vpop.eup %1572  ;;  %v1144_v38 = vmul.f32 %v1571_v4, %v1142_v52  ;;  %vm1149_vm10 = vweird.f32 %v1571_v4 }
0x10b6   :  { %v1230_v32 = vmul.f32 %v1573_v63, %v1228_v0  ;;  %vm1235_vm12 = vweird.f32 %v1573_v63  ;;  %vm1150_vm13 = vmor %vm1148_vm11, %vm1149_vm10 }
0x10b7   :  { %v1145_v5 = vsub.f32 1.0, %v1144_v38  ;;  %vm1236_vm15 = vmor %vm1234_vm14, %vm1235_vm12  ;;  %v1352_v38 = vld [vmem:[#allocation7 + $0x8] sm:$0xff] }
0x10b8   :  { %v1231_v2 = vsub.f32 1.0, %v1230_v32  ;;  %v1351_v32 = vld [vmem:[#allocation7] sm:$0xff] }
0x10b9   :  { %v1146_v3 = vmul.f32 %v1571_v4, %v1145_v5 }
0x10ba   :  { %v1232_v39 = vmul.f32 %v1573_v63, %v1231_v2 }
0x10bb   :  { %v1147_v6 = vadd.f32 %v1571_v4, %v1146_v3 }
0x10bc   :  { %v1233_v45 = vadd.f32 %v1573_v63, %v1232_v39  ;;  %v1457_v39 = vld [vmem:[%s2112_s8] ss:$0 sm:$0xff] }
0x10bd   :  { %v1151_v40 = vsel %vm1150_vm13, %v1571_v4, %v1147_v6  ;;  %v1354_v4 = vld [vmem:[#allocation7 + $0x18] sm:$0xff] }
0x10be   :  { %v1237_v8 = vsel %vm1236_vm15, %v1573_v63, %v1233_v45  ;;  %v1156_v10 = vsel %vm1153_vm0, %v1155_v1, %v1151_v40  ;;  %v1353_v63 = vld [vmem:[#allocation7 + $0x10] sm:$0xff]  ;;  %1376 = vmatpush.msra.mxu0 %v1354_v4 }
0x10bf   :  { %v1242_v51 = vsel %vm1239_vm1, %v1241_v7, %v1237_v8  ;;  %v1162_v15 = vmul.f32 %v1160_v14, %v1156_v10 }
0x10c0   :  { %v1245_v18 = vmul.f32 %v1242_v51, %v2064_v37  ;;  %1377 = vmatpush.msra.mxu0 %v1353_v63 }
0x10c2   :  { %1378 = vmatpush.msra.mxu0 %v1352_v38 }
0x10c4   :  { %1379 = vmatpush.msra.mxu0 %v1351_v32 }
0x1103   :  { %v1165_v9 = vpop.permute.xlu1 %1164 }
0x1104   :  { %v1167_v11 = vmul.f32 %v1165_v9, %v1156_v10 }
0x1105   :  { %v1248_v12 = vpop.permute.xlu2 %1247 }
0x1106   :  { %v1250_v13 = vmul.f32 %v1248_v12, %v1242_v51  ;;  %1169 = vrot.lane.b32.xlu0 %v1167_v11, %s1696_s14 }
0x1108   :  { %1252 = vrot.lane.b32.xlu1 %v1250_v13, %s1696_s14 }
0x1178   :  { %v1170_v16 = vpop.permute.xlu0 %1169 }
0x1179   :  { %v1172_v17 = vadd.f32 %v1170_v16, %v1162_v15 }
0x117a   :  { %v1253_v19 = vpop.permute.xlu1 %1252 }
0x117b   :  { %1574 = vtanh.f32 %v1172_v17  ;;  %v1255_v20 = vadd.f32 %v1253_v19, %v1245_v18 }
0x117d   :  { %1576 = vtanh.f32 %v1255_v20 }
0x1181   :  { %v1575_v21 = vpop.eup %1574 }
0x1182   :  { %1175 = vrot.lane.b32.xlu2 %v1575_v21, %s1696_s14 }
0x1183   :  { %v1577_v22 = vpop.eup %1576 }
0x1184   :  { %1258 = vrot.lane.b32.xlu0 %v1577_v22, %s1696_s14 }
0x11dc   :  { %v1176_v23 = vpop.permute.xlu2 %1175 }
0x11dd   :  { %v1178_v24 = vmul.f32 %v1176_v23, %v1156_v10 }
0x11df   :  { %v1263_v25 = vrot.slane %v1178_v24, 4 }
0x11e1   :  { %1264 = vrot.lane.b32.xlu1 %v1263_v25, %s1697_s15 }
0x11f6   :  { %v1259_v26 = vpop.permute.xlu0 %1258 }
0x11f7   :  { %v1261_v28 = vmul.f32 %v1259_v26, %v1242_v51 }
0x11f9   :  { %1289 = vrot.lane.b32.xlu2 %v1261_v28, %s1697_s15 }
0x1253   :  { %v1265_v29 = vpop.permute.xlu1 %1264  ;;  %v1290_v31 = vpop.permute.xlu2 %1289 }
0x1254   :  { %1442 = vmatmul.msk.f32.vlgmr.msra.gmra.mxu2 %vm147_vm5, %v1265_v29  ;;  %1443 = vmatmul.msk.f32.vlgmr.msra.gmra.mxu3 %vm147_vm5, %v1290_v31 }
0x12d7   :  { %v1285_v37 = vpop.f32.mrf.mxu2  ;;  %v1310_v30 = vpop.f32.mrf.mxu3 }
0x12d8   :  { %v1286_v42 = vadd.f32 %v2078_v57, %v1285_v37 }
0x12da   :  { %v1313_v43 = vadd.f32 %v1310_v30, %v1286_v42 }
0x12dc   :  { %1578 = vtanh.f32 %v1313_v43  ;;  %v1444_v47 = vmul.f32 -1.442695, %v1313_v43 }
0x12de   :  { %1580 = vpow2.f32 %v1444_v47 }
0x12e2   :  { %v1579_v46 = vpop.eup %1578 }
0x12e3   :  { %1336 = vrot.lane.b32.xlu0 %v1579_v46, %s1696_s14 }
0x12e4   :  { %v1581_v48 = vpop.eup %1580 }
0x12e5   :  { %v1317_v50 = vadd.f32 1.0, %v1581_v48 }
0x12e7   :  { %1582 = vrcp.f32 %v1317_v50  ;;  %v1329_v58 = vand.u32 2147483648, %v1317_v50  ;;  %vm1323_vm3 = vweird.f32 %v1317_v50  ;;  %v1327_v57 = vand.u32 2147483647, %v1317_v50 }
0x12e9   :  { %v1330_v36 = vor.u32 1.1754944e-38, %v1329_v58  ;;  %vm1328_vm6 = vcmp.eq.f32.partialorder %v1327_v57, 8.507059e+37 }
0x12ed   :  { %v1583_v27 = vpop.eup %1582 }
0x12ee   :  { %v1319_v53 = vmul.f32 %v1583_v27, %v1317_v50  ;;  %vm1324_vm2 = vweird.f32 %v1583_v27 }
0x12ef   :  { %vm1325_vm4 = vmor %vm1323_vm3, %vm1324_vm2 }
0x12f0   :  { %v1320_v55 = vsub.f32 1.0, %v1319_v53 }
0x12f2   :  { %v1321_v44 = vmul.f32 %v1583_v27, %v1320_v55 }
0x12f4   :  { %v1322_v56 = vadd.f32 %v1583_v27, %v1321_v44 }
0x12f6   :  { %v1326_v49 = vsel %vm1325_vm4, %v1583_v27, %v1322_v56 }
0x12f7   :  { %v1331_v60 = vsel %vm1328_vm6, %v1330_v36, %v1326_v49 }
0x12f8   :  { %v1334_v61 = vmul.f32 %v1331_v60, %v1255_v20 }
0x1355   :  { %v1337_v59 = vpop.permute.xlu0 %1336 }
0x1356   :  { %v1339_v54 = vmul.f32 %v1337_v59, %v1331_v60 }
0x1358   :  { %1341 = vrot.lane.b32.xlu1 %v1339_v54, %s1696_s14 }
0x13ca   :  { %v1342_v62 = vpop.permute.xlu1 %1341 }
0x13cb   :  { %v1344_v52 = vadd.f32 %v1342_v62, %v1334_v61 }
0x13cd   :  { %1584 = vtanh.f32 %v1344_v52 }
0x13d3   :  { %v1585_v0 = vpop.eup %1584 }
0x13d4   :  { %1347 = vrot.lane.b32.xlu2 %v1585_v0, %s1696_s14 }
0x142e   :  { %v1348_v5 = vpop.permute.xlu2 %1347 }
0x142f   :  { %v1350_v2 = vmul.f32 %v1348_v5, %v1331_v60 }
0x1431   :  { %1360 = vrot.lane.b32.xlu0 %v1350_v2, %s1697_s15 }
0x14a3   :  { %v1361_v3 = vpop.permute.xlu0 %1360 }
0x14a4   :  { %1445 = vmatmul.msk.f32.vlgmr.msra.gmra.mxu0 %vm147_vm5, %v1361_v3 }
0x1521   :  { %v1381_v6 = vpop.f32.mrf.mxu0 }
0x1522   :  { %v1382_v33 = vadd.f32 %v1457_v39, %v1381_v6 }
0x1524   :  { %1384 = vst [vmem:[#allocation8] sm:$0xf] %v1382_v33 }
0x1525   :  { %1395 = dma.vmem_to_hbm [thread:$0]  %s1391_s26, 64, %s1393_s28, [#allocation4]  }
0x1526   :  { %1688 = dma.done.wait [#allocation4], 64  }
0x1527   :  { %1689 = vsyncadd [#allocation4], 4294967232 }
0x1528   :  { %1400 = vsyncpa [#allocation3], 1 }
0x1529   :  { %1401 = vsyncpa [#allocation6], 1 }
0x152a   :  { %1402 = vsyncpa [#allocation4], 1 }

</bundles_post_ra>
